<compile_context>
chip_gen: v7x
topology: tpu7x:2x2x1
jax: 0.10.0
libtpu: 0.0.40
codegen_flags: <defaults>
</compile_context>

<pallas_src>
import jax
import jax.numpy as jnp
from jax.experimental import pallas as pl
from jax.experimental.pallas import tpu as pltpu


# ----------------------------------------------------------------------------
# helpers
# ----------------------------------------------------------------------------

def _round_up(x, m):
    return ((x + m - 1) // m) * m


def _sublane(dtype):
    # f32 -> 8 rows, bf16/f16 -> 16, int8/fp8 -> 32 (full packed vregs).
    return max(8, 32 // jnp.dtype(dtype).itemsize)


def _neg_fill(dtype):
    # Fill for padded class columns: never wins the row max, exp() -> 0,
    # and stays finite in the given dtype (f16-safe).
    dt = jnp.dtype(dtype)
    if jnp.issubdtype(dt, jnp.floating):
        return float(jnp.finfo(dt).min) / 2
    return -1e30


def _vmem_budget_bytes():
    # Per-TensorCore VMEM budget: ~100 MiB on 128 MiB chips (v5e/v6e),
    # ~48 MiB on v7x (64 MiB per TC).  Conservative fallback if unknown.
    try:
        cap = int(pltpu.get_tpu_info().vmem_capacity_bytes)
    except Exception:
        cap = 64 << 20
    return min(int(cap * 0.80), cap - (16 << 20))


# ----------------------------------------------------------------------------
# kernels
# ----------------------------------------------------------------------------

def _fused_kernel(x_ref, w_ref, b_ref, o_ref):
    # x: (TN, E)  w: (E, Cp)  b: (1, Cp) f32  o: (TN, Cp)
    x = x_ref[...]
    w = w_ref[...]
    if x.dtype != w.dtype:          # optional bf16 matmul cast (weight dtype wins)
        x = x.astype(w.dtype)
    logits = jnp.dot(x, w, preferred_element_type=jnp.float32) + b_ref[...]
    m = jnp.max(logits, axis=-1, keepdims=True)
    shifted = logits - m
    lse = jnp.log(jnp.sum(jnp.exp(shifted), axis=-1, keepdims=True))
    o_ref[...] = (shifted - lse).astype(o_ref.dtype)


def _tiled_logits_kernel(x_ref, w_ref, b_ref, logits_ref, lse_ref, m_sc, l_sc):
    # Grid: (row blocks [parallel], class blocks [arbitrary, innermost]).
    j = pl.program_id(1)

    @pl.when(j == 0)
    def _():
        m_sc[...] = jnp.full_like(m_sc, -jnp.inf)
        l_sc[...] = jnp.zeros_like(l_sc)

    x = x_ref[...]
    w = w_ref[...]
    if x.dtype != w.dtype:
        x = x.astype(w.dtype)
    logits = jnp.dot(x, w, preferred_element_type=jnp.float32) + b_ref[...]
    logits_ref[...] = logits

    m_prev = m_sc[...]
    m_new = jnp.maximum(m_prev, jnp.max(logits, axis=-1, keepdims=True))
    l_sc[...] = (l_sc[...] * jnp.exp(m_prev - m_new)
                 + jnp.sum(jnp.exp(logits - m_new), axis=-1, keepdims=True))
    m_sc[...] = m_new

    @pl.when(j == pl.num_programs(1) - 1)
    def _():
        lse_ref[...] = m_sc[...] + jnp.log(l_sc[...])


def _finalize_kernel(logits_ref, lse_ref, o_ref):
    o_ref[...] = (logits_ref[...] - lse_ref[...]).astype(o_ref.dtype)


# ----------------------------------------------------------------------------
# wrapper
# ----------------------------------------------------------------------------

def classification_forward(embeds, weight_t, bias, *, row_tile=None,
                           class_tile=None, matmul_dtype=None,
                           return_padded=False, force_class_tiled=False):
    """log_softmax(embeds @ weight_t + bias, axis=1).

    embeds:   [N, E]
    weight_t: [E, C]   (PyTorch `weight` transposed)
    bias:     [C]
    returns:  [N, C] log-probabilities (dtype of embeds), or the padded
              [N_pad, C_pad] buffer when return_padded=True.
    """
    N, E = embeds.shape
    C = weight_t.shape[1]
    dtype = embeds.dtype
    itemsize = jnp.dtype(dtype).itemsize
    sub = _sublane(dtype)

    w_dtype = jnp.dtype(matmul_dtype) if matmul_dtype is not None else jnp.dtype(dtype)
    w_itemsize = w_dtype.itemsize

    # Lane-dense class padding; 256 when MXU-bound (large E, 256x256 MXU on v6e/v7x).
    lane_mult = 256 if E >= 512 else 128
    C_pad = _round_up(max(C, lane_mult), lane_mult)

    budget = _vmem_budget_bytes()
    n_cap = _round_up(N, sub)

    # --- fused-path fit: weight resident + f32 softmax intermediates accounted ---
    per_row = (2 * E * itemsize        # double-buffered x block
               + 2 * C_pad * itemsize  # double-buffered out block
               + 3 * C_pad * 4)        # f32 logits/shifted/exp intermediates
    fixed = E * C_pad * w_itemsize + 2 * C_pad * 4 + (2 << 20)  # weight + f32 bias + slack
    max_rows_fit = (budget - fixed) // per_row if budget > fixed else 0
    use_fused = (not force_class_tiled) and max_rows_fit >= sub

    # --- common padded operands (skip pads that are no-ops) ---
    neg = _neg_fill(dtype)
    w_p = weight_t.astype(w_dtype)
    if C_pad != C:
        w_p = jnp.pad(w_p, ((0, 0), (0, C_pad - C)))
    b_p = jnp.full((1, C_pad), neg, jnp.float32).at[0, :C].set(bias.astype(jnp.float32))

    cost = pl.CostEstimate(
        flops=2 * n_cap * E * C_pad,
        transcendentals=n_cap * C_pad,
        bytes_accessed=(n_cap * E * itemsize + E * C_pad * w_itemsize
                        + C_pad * 4 + n_cap * C_pad * itemsize),
    )

    if use_fused:
        target = row_tile if row_tile is not None else 1024
        rt = min(target, n_cap, max_rows_fit)
        rt = max(sub, (rt // sub) * sub)
        N_pad = _round_up(N, rt)
        x_p = embeds if N_pad == N else jnp.pad(embeds, ((0, N_pad - N), (0, 0)))

        vmem_need = fixed + rt * per_row
        vmem_limit = int(min(budget, max(2 * vmem_need + (4 << 20), 32 << 20)))

        out = pl.pallas_call(
            _fused_kernel,
            out_shape=jax.ShapeDtypeStruct((N_pad, C_pad), dtype),
            grid_spec=pltpu.PrefetchScalarGridSpec(
                num_scalar_prefetch=0,
                grid=(N_pad // rt,),
                in_specs=[
                    pl.BlockSpec((rt, E), lambda i: (i, 0)),
                    # Constant block index over the row grid: keep one resident copy.
                    pl.BlockSpec((E, C_pad), lambda i: (0, 0),
                                 pipeline_mode=pl.Buffered(1)),
                    pl.BlockSpec((1, C_pad), lambda i: (0, 0)),
                ],
                out_specs=pl.BlockSpec((rt, C_pad), lambda i: (i, 0)),
            ),
            compiler_params=pltpu.CompilerParams(
                dimension_semantics=("parallel",),
                vmem_limit_bytes=vmem_limit,
            ),
            cost_estimate=cost,
        )(x_p, w_p, b_p)
    else:
        # ------------------ class-tiled online-LSE path ------------------
        # TODO(synk): extremely large E would also need an E (contraction) grid
        # axis with a partial-sum accumulator; here E stays within one block.
        def step_bytes(rt, ct):
            return (2 * rt * E * itemsize      # x blocks
                    + 2 * E * ct * w_itemsize  # weight blocks
                    + 2 * ct * 4               # f32 bias blocks
                    + 2 * rt * ct * 4          # f32 logits out blocks
                    + 4 * rt * 4               # lse out + m/l scratch
                    + 2 * rt * ct * 4)         # f32 intermediates

        def pick_ct(target):
            ct = max(lane_mult, min(target, C_pad))
            ct = (ct // lane_mult) * lane_mult
            while C_pad % ct:
                ct -= lane_mult
            return ct

        rt = row_tile if row_tile is not None else 256
        rt = max(sub, (min(rt, n_cap) // sub) * sub)
        ct = pick_ct(class_tile if class_tile is not None else 512)
        while step_bytes(rt, ct) + (2 << 20) > budget and ct > lane_mult:
            ct = pick_ct(ct - lane_mult)
        while step_bytes(rt, ct) + (2 << 20) > budget and rt > sub:
            rt = max(sub, (rt // 2 // sub) * sub)

        N_pad = _round_up(N, rt)
        x_p = embeds if N_pad == N else jnp.pad(embeds, ((0, N_pad - N), (0, 0)))
        vmem_limit = int(min(budget, max(step_bytes(rt, ct) + (8 << 20), 32 << 20)))
        grid = (N_pad // rt, C_pad // ct)

        logits, lse = pl.pallas_call(
            _tiled_logits_kernel,
            out_shape=(jax.ShapeDtypeStruct((N_pad, C_pad), jnp.float32),
                       jax.ShapeDtypeStruct((N_pad, 1), jnp.float32)),
            grid_spec=pltpu.PrefetchScalarGridSpec(
                num_scalar_prefetch=0,
                grid=grid,
                in_specs=[
                    pl.BlockSpec((rt, E), lambda i, j: (i, 0)),
                    pl.BlockSpec((E, ct), lambda i, j: (0, j)),
                    pl.BlockSpec((1, ct), lambda i, j: (0, j)),
                ],
                out_specs=[
                    pl.BlockSpec((rt, ct), lambda i, j: (i, j)),
                    pl.BlockSpec((rt, 1), lambda i, j: (i, 0)),
                ],
                scratch_shapes=[pltpu.VMEM((rt, 1), jnp.float32),
                                pltpu.VMEM((rt, 1), jnp.float32)],
            ),
            compiler_params=pltpu.CompilerParams(
                dimension_semantics=("parallel", "arbitrary"),
                vmem_limit_bytes=vmem_limit,
            ),
            cost_estimate=cost,
        )(x_p, w_p, b_p)

        out = pl.pallas_call(
            _finalize_kernel,
            out_shape=jax.ShapeDtypeStruct((N_pad, C_pad), dtype),
            grid_spec=pltpu.PrefetchScalarGridSpec(
                num_scalar_prefetch=0,
                grid=grid,
                in_specs=[
                    pl.BlockSpec((rt, ct), lambda i, j: (i, j)),
                    pl.BlockSpec((rt, 1), lambda i, j: (i, 0)),
                ],
                out_specs=pl.BlockSpec((rt, ct), lambda i, j: (i, j)),
            ),
            compiler_params=pltpu.CompilerParams(
                dimension_semantics=("parallel", "parallel"),
                vmem_limit_bytes=vmem_limit,
            ),
        )(logits, lse)

    if return_padded or (N_pad == N and C_pad == C):
        return out
    return out[:N, :C]


def init_classification_params(key, emb_size, num_classes):
    """Mirror PyTorch init: xavier_uniform_ on the 2D weight, default
    uniform(-1/sqrt(fan_in), 1/sqrt(fan_in)) on the 1D bias."""
    kw, kb = jax.random.split(key)
    bound_w = jnp.sqrt(6.0 / (emb_size + num_classes))
    weight = jax.random.uniform(kw, (num_classes, emb_size),
                                minval=-bound_w, maxval=bound_w,
                                dtype=jnp.float32)
    bound_b = 1.0 / jnp.sqrt(float(emb_size))
    bias = jax.random.uniform(kb, (num_classes,),
                              minval=-bound_b, maxval=bound_b,
                              dtype=jnp.float32)
    return weight, bias


if __name__ == "__main__":
    key = jax.random.PRNGKey(0)
    k_x, k_p, k_x2, k_p2 = jax.random.split(key, 4)

    # --- fused (resident-weight) path: small GNN-style head ---
    emb_size, num_classes, batch = 32, 8, 500   # ragged N exercises tail padding
    embeds = jax.random.normal(k_x, (batch, emb_size), dtype=jnp.float32)
    weight, bias = init_classification_params(k_p, emb_size, num_classes)

    logists = classification_forward(embeds, weight.T, bias)
    logists = jax.block_until_ready(logists)

    ref = jax.nn.log_softmax(
        jnp.dot(embeds, weight.T, precision=jax.lax.Precision.HIGHEST) + bias, axis=1)
    assert logists.shape == (batch, num_classes)
    assert jnp.allclose(logists, ref, atol=2e-2, rtol=2e-2), "fused path mismatch"
    assert jnp.allclose(jnp.sum(jnp.exp(logists), axis=1),
                        jnp.ones((batch,)), atol=1e-3), "fused path not normalized"

    # --- class-tiled online-LSE path (forced) to exercise the big-head fallback ---
    emb2, cls2, batch2 = 64, 200, 300
    embeds2 = jax.random.normal(k_x2, (batch2, emb2), dtype=jnp.float32)
    weight2, bias2 = init_classification_params(k_p2, emb2, cls2)

    logists2 = classification_forward(embeds2, weight2.T, bias2,
                                      force_class_tiled=True,
                                      row_tile=128, class_tile=128)
    logists2 = jax.block_until_ready(logists2)

    ref2 = jax.nn.log_softmax(
        jnp.dot(embeds2, weight2.T, precision=jax.lax.Precision.HIGHEST) + bias2, axis=1)
    assert logists2.shape == (batch2, cls2)
    assert jnp.allclose(logists2, ref2, atol=2e-2, rtol=2e-2), "tiled path mismatch"
    assert jnp.allclose(jnp.sum(jnp.exp(logists2), axis=1),
                        jnp.ones((batch2,)), atol=1e-3), "tiled path not normalized"

    print("KERNEL_OK")
</pallas_src>

<mosaic_0001>
module attributes {stable_mosaic.version = 11 : i64} {
  func.func @_fused_kernel(%arg0: i32, %arg1: memref<504x32xf32, #tpu.memory_space<vmem>>, %arg2: memref<32x128xf32, #tpu.memory_space<vmem>>, %arg3: memref<1x128xf32, #tpu.memory_space<vmem>>, %arg4: memref<504x128xf32, #tpu.memory_space<vmem>>) attributes {dimension_semantics = [#tpu.dimension_semantics<parallel>], iteration_bounds = array<i64: 1>, scalar_prefetch = 0 : i64, scratch_operands = 0 : i64, tpu.core_type = #tpu.core_type<tc>, window_params = [{transform_indices = @transform_0, window_bounds = array<i64: 504, 32>}, {pipeline_mode = #tpu.pipeline_mode<synchronous>, transform_indices = @transform_1, window_bounds = array<i64: 32, 128>}, {pipeline_mode = #tpu.pipeline_mode<synchronous>, transform_indices = @transform_2, window_bounds = array<i64: 1, 128>}, {transform_indices = @transform_3, window_bounds = array<i64: 504, 128>}]} {
    %c0 = arith.constant 0 : index
    %c0_0 = arith.constant 0 : index
    %0 = vector.load %arg1[%c0, %c0_0] : memref<504x32xf32, #tpu.memory_space<vmem>>, vector<504x32xf32>
    %c0_1 = arith.constant 0 : index
    %c0_2 = arith.constant 0 : index
    %1 = vector.load %arg2[%c0_1, %c0_2] : memref<32x128xf32, #tpu.memory_space<vmem>>, vector<32x128xf32>
    %cst = arith.constant dense<0.000000e+00> : vector<504x128xf32>
    %2 = tpu.matmul %0, %1, %cst {dimension_numbers = #tpu.dot_dimension_numbers<[1], [0], [0], [1], [0, 0, 1, 1], [], []>} : vector<504x32xf32>, vector<32x128xf32>, vector<504x128xf32> -> vector<504x128xf32>
    %c0_3 = arith.constant 0 : index
    %c0_4 = arith.constant 0 : index
    %3 = vector.load %arg3[%c0_3, %c0_4] : memref<1x128xf32, #tpu.memory_space<vmem>>, vector<1x128xf32>
    %4 = vector.broadcast %3 : vector<1x128xf32> to vector<504x128xf32>
    %5 = arith.addf %2, %4 : vector<504x128xf32>
    %cst_5 = arith.constant dense<0xFF800000> : vector<504xf32>
    %6 = vector.multi_reduction <maximumf>, %5, %cst_5 [1] : vector<504x128xf32> to vector<504xf32>
    %7 = vector.shape_cast %6 : vector<504xf32> to vector<504x1xf32>
    %8 = vector.broadcast %7 : vector<504x1xf32> to vector<504x128xf32>
    %9 = arith.subf %5, %8 : vector<504x128xf32>
    %10 = math.exp %9 : vector<504x128xf32>
    %cst_6 = arith.constant dense<0.000000e+00> : vector<504xf32>
    %11 = vector.multi_reduction <add>, %10, %cst_6 [1] : vector<504x128xf32> to vector<504xf32>
    %12 = vector.shape_cast %11 : vector<504xf32> to vector<504x1xf32>
    %13 = math.log %12 : vector<504x1xf32>
    %14 = vector.broadcast %13 : vector<504x1xf32> to vector<504x128xf32>
    %15 = arith.subf %9, %14 : vector<504x128xf32>
    %c0_7 = arith.constant 0 : index
    %c0_8 = arith.constant 0 : index
    %16 = vector.load %arg4[%c0_7, %c0_8] : memref<504x128xf32, #tpu.memory_space<vmem>>, vector<504x128xf32>
    tpu.vector_store %arg4[%c0_7, %c0_8], %15 {strides = array<i32>} : memref<504x128xf32, #tpu.memory_space<vmem>>, vector<504x128xf32>,
    return
  }
  func.func @transform_0(%arg0: i32) -> (i32, i32) {
    %c0_i32 = arith.constant 0 : i32
    %c0_i32_0 = arith.constant 0 : i32
    return %arg0, %c0_i32 : i32, i32
  }
  func.func @transform_1(%arg0: i32) -> (i32, i32) {
    %c0_i32 = arith.constant 0 : i32
    %c0_i32_0 = arith.constant 0 : i32
    %c0_i32_1 = arith.constant 0 : i32
    return %c0_i32, %c0_i32_0 : i32, i32
  }
  func.func @transform_2(%arg0: i32) -> (i32, i32) {
    %c0_i32 = arith.constant 0 : i32
    %c0_i32_0 = arith.constant 0 : i32
    %c0_i32_1 = arith.constant 0 : i32
    return %c0_i32, %c0_i32_0 : i32, i32
  }
  func.func @transform_3(%arg0: i32) -> (i32, i32) {
    %c0_i32 = arith.constant 0 : i32
    %c0_i32_0 = arith.constant 0 : i32
    return %arg0, %c0_i32 : i32, i32
  }
}

</mosaic_0001>

<bundles_post_ra>
// kernel: tpu_custom_call.1
= control target key start
LH: loop header
LB: loop body
LE: loop exit
PB: predicated region body
PF: predicated region fallthrough
CT: control target
= control target key end

     0   :  { %v1988_v3 = vmov 0.0|0.0   ;;  %vm1989_vm0 = vmmov 0   ;;  %v1990_v6 = vmov 0.0   ;;  %vm89_vm1 = vcmask 261120   ;;  %s2988_s0 = inlined_call_operand.vmem [shape: f32[504,32], index: 0, kind: input, shape index: {}]   ;;  %s2989_s1 = inlined_call_operand.vmem [shape: f32[32,128], index: 1, kind: input, shape index: {}]   ;;  %s2990_s2 = inlined_call_operand.vmem [shape: f32[1,128], index: 2, kind: input, shape index: {}]   ;;  %s2991_s3 = inlined_call_operand.hbm [shape: f32[504,128], index: 3, kind: output, shape index: {}]  }
   0x1   :  { %v78_v0 = vld [vmem:[%s2989_s1] sm:$0xff]  ;;  %v79_v1 = vld [vmem:[%s2989_s1 + $0x8] sm:$0xff]  ;;  %v80_v2 = vld [vmem:[%s2989_s1 + $0x10] sm:$0xff]  ;;  %1696 = vmatprep.subr.bf16.mxu0 %v1988_v3  ;;  %1702 = vmatprep.subr.bf16.mxu1 %v1988_v3 }
   0x2   :  { %v1697_v4 = vpack.c.bf16 %v79_v1, %v78_v0  ;;  %v81_v5 = vld [vmem:[%s2989_s1 + $0x18] sm:$0xff]  ;;  %1507 = vmatprep.mubr.msk.f32.mxu0 %vm1989_vm0, %v1990_v6  ;;  %1603 = vmatprep.mubr.msk.f32.mxu1 %vm1989_vm0, %v1990_v6  ;;  %v15_v8 = vld [vmem:[%s2988_s0] sm:$0xff]  ;;  %v16_v10 = vld [vmem:[%s2988_s0 + $0x8] sm:$0xff] }
   0x3   :  { %v1700_v7 = vpack.c.bf16 %v81_v5, %v80_v2  ;;  %v47_v9 = vld [vmem:[%s2988_s0 + $0x100] sm:$0xff]  ;;  %v48_v11 = vld [vmem:[%s2988_s0 + $0x108] sm:$0xff]  ;;  %v17_v12 = vld [vmem:[%s2988_s0 + $0x10] sm:$0xff] }
   0x4   :  { %1698 = vmatpush3.bf16.msra.mxu0 %v1697_v4  ;;  %1704 = vmatpush3.bf16.msra.mxu1 %v1697_v4  ;;  %v49_v13 = vld [vmem:[%s2988_s0 + $0x110] sm:$0xff]  ;;  %v18_v14 = vld [vmem:[%s2988_s0 + $0x18] sm:$0xff] }
   0x5   :  { %1699 = vmatprep.subr.bf16.mxu0 %v1988_v3  ;;  %1703 = vmatprep.subr.bf16.mxu1 %v1988_v3  ;;  %v50_v15 = vld [vmem:[%s2988_s0 + $0x118] sm:$0xff] }
   0x8   :  { %1701 = vmatpush3.bf16.msra.mxu0 %v1700_v7  ;;  %1705 = vmatpush3.bf16.msra.mxu1 %v1700_v7 }
   0xb   :  { %1508 = vmatmul.mubr.msk.f32.vlgmr.msra.gmra.mrb[0].mxu0 %vm89_vm1, %v15_v8  ;;  %1604 = vmatmul.mubr.msk.f32.vlgmr.msra.gmra.mrb[0].mxu1 %vm89_vm1, %v47_v9 }
   0xc   :  { %1510 = vmatprep.mubr.msk.f32.mxu0 %vm1989_vm0, %v1990_v6  ;;  %1606 = vmatprep.mubr.msk.f32.mxu1 %vm1989_vm0, %v1990_v6 }
   0xf   :  { %1511 = vmatmul.mubr.msk.f32.gmra.mrb[2].mxu0 %vm89_vm1, %v16_v10  ;;  %1607 = vmatmul.mubr.msk.f32.gmra.mrb[2].mxu1 %vm89_vm1, %v48_v11 }
  0x10   :  { %1513 = vmatprep.mubr.msk.f32.mxu0 %vm1989_vm0, %v1990_v6  ;;  %1609 = vmatprep.mubr.msk.f32.mxu1 %vm1989_vm0, %v1990_v6 }
  0x13   :  { %1514 = vmatmul.mubr.msk.f32.gmra.mrb[4].mxu0 %vm89_vm1, %v17_v12  ;;  %1610 = vmatmul.mubr.msk.f32.gmra.mrb[4].mxu1 %vm89_vm1, %v49_v13 }
  0x14   :  { %1516 = vmatprep.mubr.msk.f32.mxu0 %vm1989_vm0, %v1990_v6  ;;  %1612 = vmatprep.mubr.msk.f32.mxu1 %vm1989_vm0, %v1990_v6 }
  0x17   :  { %1517 = vmatmul.mubr.msk.f32.gmra.mrb[6].mxu0 %vm89_vm1, %v18_v14  ;;  %1613 = vmatmul.mubr.msk.f32.gmra.mrb[6].mxu1 %vm89_vm1, %v50_v15 }
  0x18   :  { %8 = vsyncpa [#allocation3], 0  ;;  %1519 = vmatprep.mubr.msk.f32.mxu0 %vm1989_vm0, %v1990_v6  ;;  %v19_v16 = vld [vmem:[%s2988_s0 + $0x20] sm:$0xff]  ;;  %1615 = vmatprep.mubr.msk.f32.mxu1 %vm1989_vm0, %v1990_v6  ;;  %v20_v18 = vld [vmem:[%s2988_s0 + $0x28] sm:$0xff] }
  0x19   :  { %v51_v17 = vld [vmem:[%s2988_s0 + $0x120] sm:$0xff]  ;;  %v52_v19 = vld [vmem:[%s2988_s0 + $0x128] sm:$0xff]  ;;  %v21_v20 = vld [vmem:[%s2988_s0 + $0x30] sm:$0xff] }
  0x1a   :  { %v53_v21 = vld [vmem:[%s2988_s0 + $0x130] sm:$0xff]  ;;  %v22_v22 = vld [vmem:[%s2988_s0 + $0x38] sm:$0xff]  ;;  %v23_v24 = vld [vmem:[%s2988_s0 + $0x40] sm:$0xff] }
  0x1b   :  { %1520 = vmatmul.mubr.msk.f32.gmra.mrb[8].mxu0 %vm89_vm1, %v19_v16  ;;  %1616 = vmatmul.mubr.msk.f32.gmra.mrb[8].mxu1 %vm89_vm1, %v51_v17  ;;  %v54_v23 = vld [vmem:[%s2988_s0 + $0x138] sm:$0xff]  ;;  %v55_v25 = vld [vmem:[%s2988_s0 + $0x140] sm:$0xff]  ;;  %v24_v26 = vld [vmem:[%s2988_s0 + $0x48] sm:$0xff] }
  0x1c   :  { %1522 = vmatprep.mubr.msk.f32.mxu0 %vm1989_vm0, %v1990_v6  ;;  %1618 = vmatprep.mubr.msk.f32.mxu1 %vm1989_vm0, %v1990_v6  ;;  %v56_v27 = vld [vmem:[%s2988_s0 + $0x148] sm:$0xff]  ;;  %v25_v28 = vld [vmem:[%s2988_s0 + $0x50] sm:$0xff]  ;;  %v26_v30 = vld [vmem:[%s2988_s0 + $0x58] sm:$0xff] }
  0x1d   :  { %v57_v29 = vld [vmem:[%s2988_s0 + $0x150] sm:$0xff]  ;;  %v58_v31 = vld [vmem:[%s2988_s0 + $0x158] sm:$0xff]  ;;  %v27_v32 = vld [vmem:[%s2988_s0 + $0x60] sm:$0xff] }
  0x1e   :  { %v59_v33 = vld [vmem:[%s2988_s0 + $0x160] sm:$0xff]  ;;  %v28_v34 = vld [vmem:[%s2988_s0 + $0x68] sm:$0xff]  ;;  %v29_v36 = vld [vmem:[%s2988_s0 + $0x70] sm:$0xff] }
  0x1f   :  { %1523 = vmatmul.mubr.msk.f32.gmra.mrb[10].mxu0 %vm89_vm1, %v20_v18  ;;  %1619 = vmatmul.mubr.msk.f32.gmra.mrb[10].mxu1 %vm89_vm1, %v52_v19  ;;  %v60_v35 = vld [vmem:[%s2988_s0 + $0x168] sm:$0xff]  ;;  %v61_v37 = vld [vmem:[%s2988_s0 + $0x170] sm:$0xff]  ;;  %v30_v38 = vld [vmem:[%s2988_s0 + $0x78] sm:$0xff] }
  0x20   :  { %1525 = vmatprep.mubr.msk.f32.mxu0 %vm1989_vm0, %v1990_v6  ;;  %1621 = vmatprep.mubr.msk.f32.mxu1 %vm1989_vm0, %v1990_v6  ;;  %v62_v39 = vld [vmem:[%s2988_s0 + $0x178] sm:$0xff]  ;;  %v31_v40 = vld [vmem:[%s2988_s0 + $0x80] sm:$0xff]  ;;  %v32_v42 = vld [vmem:[%s2988_s0 + $0x88] sm:$0xff] }
  0x21   :  { %v63_v41 = vld [vmem:[%s2988_s0 + $0x180] sm:$0xff]  ;;  %v64_v43 = vld [vmem:[%s2988_s0 + $0x188] sm:$0xff]  ;;  %v33_v44 = vld [vmem:[%s2988_s0 + $0x90] sm:$0xff] }
  0x22   :  { %v65_v45 = vld [vmem:[%s2988_s0 + $0x190] sm:$0xff]  ;;  %v34_v46 = vld [vmem:[%s2988_s0 + $0x98] sm:$0xff]  ;;  %v35_v48 = vld [vmem:[%s2988_s0 + $0xa0] sm:$0xff] }
  0x23   :  { %1526 = vmatmul.mubr.msk.f32.gmra.mrb[12].mxu0 %vm89_vm1, %v21_v20  ;;  %1622 = vmatmul.mubr.msk.f32.gmra.mrb[12].mxu1 %vm89_vm1, %v53_v21  ;;  %v66_v47 = vld [vmem:[%s2988_s0 + $0x198] sm:$0xff]  ;;  %v67_v49 = vld [vmem:[%s2988_s0 + $0x1a0] sm:$0xff]  ;;  %v36_v50 = vld [vmem:[%s2988_s0 + $0xa8] sm:$0xff] }
  0x24   :  { %1528 = vmatprep.mubr.msk.f32.mxu0 %vm1989_vm0, %v1990_v6  ;;  %1624 = vmatprep.mubr.msk.f32.mxu1 %vm1989_vm0, %v1990_v6  ;;  %v68_v51 = vld [vmem:[%s2988_s0 + $0x1a8] sm:$0xff]  ;;  %v37_v52 = vld [vmem:[%s2988_s0 + $0xb0] sm:$0xff]  ;;  %v38_v54 = vld [vmem:[%s2988_s0 + $0xb8] sm:$0xff] }
  0x25   :  { %v69_v53 = vld [vmem:[%s2988_s0 + $0x1b0] sm:$0xff]  ;;  %v70_v55 = vld [vmem:[%s2988_s0 + $0x1b8] sm:$0xff]  ;;  %v39_v56 = vld [vmem:[%s2988_s0 + $0xc0] sm:$0xff] }
  0x26   :  { %v71_v57 = vld [vmem:[%s2988_s0 + $0x1c0] sm:$0xff]  ;;  %v40_v58 = vld [vmem:[%s2988_s0 + $0xc8] sm:$0xff]  ;;  %v41_v60 = vld [vmem:[%s2988_s0 + $0xd0] sm:$0xff] }
  0x27   :  { %1529 = vmatmul.mubr.msk.f32.gmra.mrb[14].mxu0 %vm89_vm1, %v22_v22  ;;  %1625 = vmatmul.mubr.msk.f32.gmra.mrb[14].mxu1 %vm89_vm1, %v54_v23  ;;  %v72_v59 = vld [vmem:[%s2988_s0 + $0x1c8] sm:$0xff]  ;;  %v73_v61 = vld [vmem:[%s2988_s0 + $0x1d0] sm:$0xff]  ;;  %v42_v62 = vld [vmem:[%s2988_s0 + $0xd8] sm:$0xff] }
  0x28   :  { %1531 = vmatprep.mubr.msk.f32.mxu0 %vm1989_vm0, %v1990_v6  ;;  %1627 = vmatprep.mubr.msk.f32.mxu1 %vm1989_vm0, %v1990_v6  ;;  %v74_v63 = vld [vmem:[%s2988_s0 + $0x1d8] sm:$0xff]  ;;  %v43_v0 = vld [vmem:[%s2988_s0 + $0xe0] sm:$0xff]  ;;  %v44_v2 = vld [vmem:[%s2988_s0 + $0xe8] sm:$0xff] }
  0x29   :  { %v75_v1 = vld [vmem:[%s2988_s0 + $0x1e0] sm:$0xff]  ;;  %v76_v3 = vld [vmem:[%s2988_s0 + $0x1e8] sm:$0xff]  ;;  %v45_v4 = vld [vmem:[%s2988_s0 + $0xf0] sm:$0xff] }
  0x2a   :  { %v77_v5 = vld [vmem:[%s2988_s0 + $0x1f0] sm:$0xff]  ;;  %v46_v7 = vld [vmem:[%s2988_s0 + $0xf8] sm:$0xff]  ;;  %v2407_v8 = vld [vmem:[%s2990_s2] ss:$0 sm:$0xff]  ;;  %s1991_s0 = smov [#allocation2]  }
  0x2b   :  { %1532 = vmatmul.mubr.msk.f32.gmra.mrb[16].mxu0 %vm89_vm1, %v23_v24  ;;  %1628 = vmatmul.mubr.msk.f32.gmra.mrb[16].mxu1 %vm89_vm1, %v55_v25  ;;  %s1357_s2 = sshll.u32 %s1991_s0, 4  ;;  %s1358_s2 = int_to_ptr.vmem [resolvable:$true] %s1357_s2 }
  0x2c   :  { %1534 = vmatprep.mubr.msk.f32.mxu0 %vm1989_vm0, %v1990_v6  ;;  %1630 = vmatprep.mubr.msk.f32.mxu1 %vm1989_vm0, %v1990_v6  ;;  %s1964_s8 = scalar_lea.vmem %s1358_s2, 8064  ;;  %p1969_p1 = scmp.lt.s32.totalorder %s1358_s2, %s1358_s2 }
  0x2d   :  { %p1965_p0 = scmp.ne.s32.totalorder %s1358_s2, %s1964_s8  ;;  %p1970_p2 = scmp.lt.s32.totalorder %s1964_s8, %s1964_s8 }
  0x2f   :  { %1535 = vmatmul.mubr.msk.f32.gmra.mrb[18].mxu0 %vm89_vm1, %v24_v26  ;;  %1631 = vmatmul.mubr.msk.f32.gmra.mrb[18].mxu1 %vm89_vm1, %v56_v27  ;;  %p1971_p3 = por %p1970_p2, %p1969_p1 }
  0x30   :  { %1537 = vmatprep.mubr.msk.f32.mxu0 %vm1989_vm0, %v1990_v6  ;;  %1633 = vmatprep.mubr.msk.f32.mxu1 %vm1989_vm0, %v1990_v6 }
  0x31   :  { %p1972_p4 = pnand %p1971_p3, %p1965_p0 }
  0x33   :  { %1538 = vmatmul.mubr.msk.f32.gmra.mrb[20].mxu0 %vm89_vm1, %v25_v28  ;;  %1634 = vmatmul.mubr.msk.f32.gmra.mrb[20].mxu1 %vm89_vm1, %v57_v29 }
  0x34   :  { %1540 = vmatprep.mubr.msk.f32.mxu0 %vm1989_vm0, %v1990_v6  ;;  %1636 = vmatprep.mubr.msk.f32.mxu1 %vm1989_vm0, %v1990_v6 }
  0x37   :  { %1541 = vmatmul.mubr.msk.f32.gmra.mrb[22].mxu0 %vm89_vm1, %v26_v30  ;;  %1637 = vmatmul.mubr.msk.f32.gmra.mrb[22].mxu1 %vm89_vm1, %v58_v31 }
  0x38   :  { %1543 = vmatprep.mubr.msk.f32.mxu0 %vm1989_vm0, %v1990_v6  ;;  %1639 = vmatprep.mubr.msk.f32.mxu1 %vm1989_vm0, %v1990_v6 }
  0x3b   :  { %1544 = vmatmul.mubr.msk.f32.gmra.mrb[24].mxu0 %vm89_vm1, %v27_v32  ;;  %1640 = vmatmul.mubr.msk.f32.gmra.mrb[24].mxu1 %vm89_vm1, %v59_v33 }
  0x3c   :  { %1546 = vmatprep.mubr.msk.f32.mxu0 %vm1989_vm0, %v1990_v6  ;;  %1642 = vmatprep.mubr.msk.f32.mxu1 %vm1989_vm0, %v1990_v6 }
  0x3f   :  { %1547 = vmatmul.mubr.msk.f32.gmra.mrb[26].mxu0 %vm89_vm1, %v28_v34  ;;  %1643 = vmatmul.mubr.msk.f32.gmra.mrb[26].mxu1 %vm89_vm1, %v60_v35 }
  0x40   :  { %1549 = vmatprep.mubr.msk.f32.mxu0 %vm1989_vm0, %v1990_v6  ;;  %1645 = vmatprep.mubr.msk.f32.mxu1 %vm1989_vm0, %v1990_v6 }
  0x43   :  { %1550 = vmatmul.mubr.msk.f32.gmra.mrb[28].mxu0 %vm89_vm1, %v29_v36  ;;  %1646 = vmatmul.mubr.msk.f32.gmra.mrb[28].mxu1 %vm89_vm1, %v61_v37 }
  0x44   :  { %1552 = vmatprep.mubr.msk.f32.mxu0 %vm1989_vm0, %v1990_v6  ;;  %1648 = vmatprep.mubr.msk.f32.mxu1 %vm1989_vm0, %v1990_v6 }
  0x47   :  { %1553 = vmatmul.mubr.msk.f32.gmra.mrb[30].mxu0 %vm89_vm1, %v30_v38  ;;  %1649 = vmatmul.mubr.msk.f32.gmra.mrb[30].mxu1 %vm89_vm1, %v62_v39 }
  0x48   :  { %1555 = vmatprep.mubr.msk.f32.mxu0 %vm1989_vm0, %v1990_v6  ;;  %1651 = vmatprep.mubr.msk.f32.mxu1 %vm1989_vm0, %v1990_v6 }
  0x4b   :  { %1556 = vmatmul.mubr.msk.f32.gmra.mrb[32].mxu0 %vm89_vm1, %v31_v40  ;;  %1652 = vmatmul.mubr.msk.f32.gmra.mrb[32].mxu1 %vm89_vm1, %v63_v41 }
  0x4c   :  { %1558 = vmatprep.mubr.msk.f32.mxu0 %vm1989_vm0, %v1990_v6  ;;  %1654 = vmatprep.mubr.msk.f32.mxu1 %vm1989_vm0, %v1990_v6 }
  0x4f   :  { %1559 = vmatmul.mubr.msk.f32.gmra.mrb[34].mxu0 %vm89_vm1, %v32_v42  ;;  %1655 = vmatmul.mubr.msk.f32.gmra.mrb[34].mxu1 %vm89_vm1, %v64_v43 }
  0x50   :  { %1561 = vmatprep.mubr.msk.f32.mxu0 %vm1989_vm0, %v1990_v6  ;;  %1657 = vmatprep.mubr.msk.f32.mxu1 %vm1989_vm0, %v1990_v6 }
  0x53   :  { %1562 = vmatmul.mubr.msk.f32.gmra.mrb[36].mxu0 %vm89_vm1, %v33_v44  ;;  %1658 = vmatmul.mubr.msk.f32.gmra.mrb[36].mxu1 %vm89_vm1, %v65_v45 }
  0x54   :  { %1564 = vmatprep.mubr.msk.f32.mxu0 %vm1989_vm0, %v1990_v6  ;;  %1660 = vmatprep.mubr.msk.f32.mxu1 %vm1989_vm0, %v1990_v6 }
  0x57   :  { %1565 = vmatmul.mubr.msk.f32.gmra.mrb[38].mxu0 %vm89_vm1, %v34_v46  ;;  %1661 = vmatmul.mubr.msk.f32.gmra.mrb[38].mxu1 %vm89_vm1, %v66_v47 }
  0x58   :  { %1567 = vmatprep.mubr.msk.f32.mxu0 %vm1989_vm0, %v1990_v6  ;;  %1663 = vmatprep.mubr.msk.f32.mxu1 %vm1989_vm0, %v1990_v6 }
  0x5b   :  { %1568 = vmatmul.mubr.msk.f32.gmra.mrb[40].mxu0 %vm89_vm1, %v35_v48  ;;  %1664 = vmatmul.mubr.msk.f32.gmra.mrb[40].mxu1 %vm89_vm1, %v67_v49 }
  0x5c   :  { %1570 = vmatprep.mubr.msk.f32.mxu0 %vm1989_vm0, %v1990_v6  ;;  %1666 = vmatprep.mubr.msk.f32.mxu1 %vm1989_vm0, %v1990_v6 }
  0x5f   :  { %1571 = vmatmul.mubr.msk.f32.gmra.mrb[42].mxu0 %vm89_vm1, %v36_v50  ;;  %1667 = vmatmul.mubr.msk.f32.gmra.mrb[42].mxu1 %vm89_vm1, %v68_v51 }
  0x60   :  { %1573 = vmatprep.mubr.msk.f32.mxu0 %vm1989_vm0, %v1990_v6  ;;  %1669 = vmatprep.mubr.msk.f32.mxu1 %vm1989_vm0, %v1990_v6 }
  0x63   :  { %1574 = vmatmul.mubr.msk.f32.gmra.mrb[44].mxu0 %vm89_vm1, %v37_v52  ;;  %1670 = vmatmul.mubr.msk.f32.gmra.mrb[44].mxu1 %vm89_vm1, %v69_v53 }
  0x64   :  { %1576 = vmatprep.mubr.msk.f32.mxu0 %vm1989_vm0, %v1990_v6  ;;  %1672 = vmatprep.mubr.msk.f32.mxu1 %vm1989_vm0, %v1990_v6 }
  0x67   :  { %1577 = vmatmul.mubr.msk.f32.gmra.mrb[46].mxu0 %vm89_vm1, %v38_v54  ;;  %1673 = vmatmul.mubr.msk.f32.gmra.mrb[46].mxu1 %vm89_vm1, %v70_v55 }
  0x68   :  { %1579 = vmatprep.mubr.msk.f32.mxu0 %vm1989_vm0, %v1990_v6  ;;  %1675 = vmatprep.mubr.msk.f32.mxu1 %vm1989_vm0, %v1990_v6 }
  0x6b   :  { %1580 = vmatmul.mubr.msk.f32.gmra.mrb[48].mxu0 %vm89_vm1, %v39_v56  ;;  %1676 = vmatmul.mubr.msk.f32.gmra.mrb[48].mxu1 %vm89_vm1, %v71_v57 }
  0x6c   :  { %1582 = vmatprep.mubr.msk.f32.mxu0 %vm1989_vm0, %v1990_v6  ;;  %1678 = vmatprep.mubr.msk.f32.mxu1 %vm1989_vm0, %v1990_v6 }
  0x6f   :  { %1583 = vmatmul.mubr.msk.f32.gmra.mrb[50].mxu0 %vm89_vm1, %v40_v58  ;;  %1679 = vmatmul.mubr.msk.f32.gmra.mrb[50].mxu1 %vm89_vm1, %v72_v59 }
  0x70   :  { %1585 = vmatprep.mubr.msk.f32.mxu0 %vm1989_vm0, %v1990_v6  ;;  %1681 = vmatprep.mubr.msk.f32.mxu1 %vm1989_vm0, %v1990_v6 }
  0x73   :  { %1586 = vmatmul.mubr.msk.f32.gmra.mrb[52].mxu0 %vm89_vm1, %v41_v60  ;;  %1682 = vmatmul.mubr.msk.f32.gmra.mrb[52].mxu1 %vm89_vm1, %v73_v61 }
  0x74   :  { %1588 = vmatprep.mubr.msk.f32.mxu0 %vm1989_vm0, %v1990_v6  ;;  %1684 = vmatprep.mubr.msk.f32.mxu1 %vm1989_vm0, %v1990_v6 }
  0x77   :  { %1589 = vmatmul.mubr.msk.f32.gmra.mrb[54].mxu0 %vm89_vm1, %v42_v62  ;;  %1685 = vmatmul.mubr.msk.f32.gmra.mrb[54].mxu1 %vm89_vm1, %v74_v63 }
  0x78   :  { %1591 = vmatprep.mubr.msk.f32.mxu0 %vm1989_vm0, %v1990_v6  ;;  %1687 = vmatprep.mubr.msk.f32.mxu1 %vm1989_vm0, %v1990_v6 }
  0x7b   :  { %1592 = vmatmul.mubr.msk.f32.gmra.mrb[56].mxu0 %vm89_vm1, %v43_v0  ;;  %1688 = vmatmul.mubr.msk.f32.gmra.mrb[56].mxu1 %vm89_vm1, %v75_v1 }
  0x7c   :  { %1594 = vmatprep.mubr.msk.f32.mxu0 %vm1989_vm0, %v1990_v6  ;;  %1690 = vmatprep.mubr.msk.f32.mxu1 %vm1989_vm0, %v1990_v6 }
  0x7f   :  { %1595 = vmatmul.mubr.msk.f32.gmra.mrb[58].mxu0 %vm89_vm1, %v44_v2  ;;  %1691 = vmatmul.mubr.msk.f32.gmra.mrb[58].mxu1 %vm89_vm1, %v76_v3 }
  0x80   :  { %1597 = vmatprep.mubr.msk.f32.mxu0 %vm1989_vm0, %v1990_v6  ;;  %1693 = vmatprep.mubr.msk.f32.mxu1 %vm1989_vm0, %v1990_v6 }
  0x83   :  { %1598 = vmatmul.mubr.msk.f32.gmra.mrb[60].mxu0 %vm89_vm1, %v45_v4  ;;  %1694 = vmatmul.mubr.msk.f32.gmra.mrb[60].mxu1 %vm89_vm1, %v77_v5 }
  0x84   :  { %1600 = vmatprep.mubr.msk.f32.mxu0 %vm1989_vm0, %v1990_v6 }
  0x87   :  { %1601 = vmatmul.mubr.msk.f32.gmra.mrb[62].mxu0 %vm89_vm1, %v46_v7 }
  0xde   :  { %v345_v9 = vpop.f32.mrb[0].mxu0  ;;  %v505_v10 = vpop.f32.mrb[0].mxu1 }
  0xdf   :  { %v2410_v11 = vadd.f32 %v2407_v8, %v345_v9  ;;  %v1509_v12 = vpop.f32.mrb[1].mxu0  ;;  %v1605_v13 = vpop.f32.mrb[1].mxu1  ;;  %v2414_v15 = vadd.f32 %v2407_v8, %v505_v10 }
  0xe1   :  { %659 = vmax.xlane.f32.xlu0 %v2410_v11 }
  0xe2   :  { %v350_v6 = vpop.f32.mrb[2].mxu0  ;;  %v510_v14 = vpop.f32.mrb[2].mxu1 }
  0xe3   :  { %v2417_v16 = vadd.f32 %v2407_v8, %v510_v14  ;;  %v1512_v17 = vpop.f32.mrb[3].mxu0  ;;  %v1608_v18 = vpop.f32.mrb[3].mxu1  ;;  %v2422_v21 = vadd.f32 %v2407_v8, %v350_v6 }
  0xe5   :  { %725 = vmax.xlane.f32.xlu1 %v2417_v16  ;;  %723 = vmax.xlane.f32.xlu0 %v2414_v15 }
  0xe6   :  { %v355_v19 = vpop.f32.mrb[4].mxu0  ;;  %v515_v20 = vpop.f32.mrb[4].mxu1 }
  0xe7   :  { %v2425_v22 = vadd.f32 %v2407_v8, %v355_v19  ;;  %v1515_v23 = vpop.f32.mrb[5].mxu0  ;;  %v1611_v24 = vpop.f32.mrb[5].mxu1  ;;  %v2428_v25 = vadd.f32 %v2407_v8, %v515_v20 }
  0xe9   :  { %661 = vmax.xlane.f32.xlu0 %v2422_v21  ;;  %663 = vmax.xlane.f32.xlu1 %v2425_v22 }
  0xea   :  { %v360_v26 = vpop.f32.mrb[6].mxu0  ;;  %v520_v27 = vpop.f32.mrb[6].mxu1 }
  0xeb   :  { %v2433_v28 = vadd.f32 %v2407_v8, %v360_v26  ;;  %v1518_v29 = vpop.f32.mrb[7].mxu0  ;;  %v1614_v30 = vpop.f32.mrb[7].mxu1  ;;  %v2436_v31 = vadd.f32 %v2407_v8, %v520_v27 }
  0xed   :  { %727 = vmax.xlane.f32.xlu0 %v2428_v25  ;;  %665 = vmax.xlane.f32.xlu1 %v2433_v28 }
  0xee   :  { %v365_v32 = vpop.f32.mrb[8].mxu0  ;;  %v525_v33 = vpop.f32.mrb[8].mxu1 }
  0xef   :  { %v2441_v34 = vadd.f32 %v2407_v8, %v365_v32  ;;  %v1521_v35 = vpop.f32.mrb[9].mxu0  ;;  %v1617_v36 = vpop.f32.mrb[9].mxu1  ;;  %v2444_v37 = vadd.f32 %v2407_v8, %v525_v33 }
  0xf1   :  { %729 = vmax.xlane.f32.xlu1 %v2436_v31  ;;  %667 = vmax.xlane.f32.xlu0 %v2441_v34 }
  0xf2   :  { %v370_v38 = vpop.f32.mrb[10].mxu0  ;;  %v530_v39 = vpop.f32.mrb[10].mxu1 }
  0xf3   :  { %v2449_v40 = vadd.f32 %v2407_v8, %v370_v38  ;;  %v1524_v41 = vpop.f32.mrb[11].mxu0  ;;  %v1620_v42 = vpop.f32.mrb[11].mxu1  ;;  %v2452_v43 = vadd.f32 %v2407_v8, %v530_v39 }
  0xf5   :  { %731 = vmax.xlane.f32.xlu0 %v2444_v37  ;;  %669 = vmax.xlane.f32.xlu1 %v2449_v40 }
  0xf6   :  { %v375_v44 = vpop.f32.mrb[12].mxu0  ;;  %v535_v45 = vpop.f32.mrb[12].mxu1 }
  0xf7   :  { %v2457_v46 = vadd.f32 %v2407_v8, %v375_v44  ;;  %v1527_v47 = vpop.f32.mrb[13].mxu0  ;;  %v1623_v48 = vpop.f32.mrb[13].mxu1  ;;  %v2460_v49 = vadd.f32 %v2407_v8, %v535_v45 }
  0xf9   :  { %733 = vmax.xlane.f32.xlu1 %v2452_v43  ;;  %671 = vmax.xlane.f32.xlu0 %v2457_v46 }
  0xfa   :  { %v380_v50 = vpop.f32.mrb[14].mxu0  ;;  %v540_v51 = vpop.f32.mrb[14].mxu1 }
  0xfb   :  { %v2465_v52 = vadd.f32 %v2407_v8, %v380_v50  ;;  %v1530_v53 = vpop.f32.mrb[15].mxu0  ;;  %v1626_v54 = vpop.f32.mrb[15].mxu1  ;;  %v2468_v55 = vadd.f32 %v2407_v8, %v540_v51 }
  0xfd   :  { %735 = vmax.xlane.f32.xlu0 %v2460_v49  ;;  %673 = vmax.xlane.f32.xlu1 %v2465_v52 }
  0xfe   :  { %v385_v56 = vpop.f32.mrb[16].mxu0  ;;  %v545_v57 = vpop.f32.mrb[16].mxu1 }
  0xff   :  { %v2473_v58 = vadd.f32 %v2407_v8, %v385_v56  ;;  %v1533_v59 = vpop.f32.mrb[17].mxu0  ;;  %v1629_v60 = vpop.f32.mrb[17].mxu1  ;;  %v2476_v61 = vadd.f32 %v2407_v8, %v545_v57 }
 0x101   :  { %737 = vmax.xlane.f32.xlu1 %v2468_v55  ;;  %675 = vmax.xlane.f32.xlu0 %v2473_v58 }
 0x102   :  { %v390_v62 = vpop.f32.mrb[18].mxu0  ;;  %v550_v63 = vpop.f32.mrb[18].mxu1 }
 0x103   :  { %v2481_v0 = vadd.f32 %v2407_v8, %v390_v62  ;;  %v1536_v1 = vpop.f32.mrb[19].mxu0  ;;  %v1632_v2 = vpop.f32.mrb[19].mxu1  ;;  %v2484_v3 = vadd.f32 %v2407_v8, %v550_v63 }
 0x105   :  { %739 = vmax.xlane.f32.xlu0 %v2476_v61  ;;  %677 = vmax.xlane.f32.xlu1 %v2481_v0 }
 0x106   :  { %v395_v4 = vpop.f32.mrb[20].mxu0  ;;  %v555_v5 = vpop.f32.mrb[20].mxu1 }
 0x107   :  { %v2489_v7 = vadd.f32 %v2407_v8, %v395_v4  ;;  %v1539_v9 = vpop.f32.mrb[21].mxu0  ;;  %v1635_v10 = vpop.f32.mrb[21].mxu1  ;;  %v2492_v12 = vadd.f32 %v2407_v8, %v555_v5 }
 0x109   :  { %741 = vmax.xlane.f32.xlu1 %v2484_v3  ;;  %679 = vmax.xlane.f32.xlu0 %v2489_v7 }
 0x10a   :  { %v400_v13 = vpop.f32.mrb[22].mxu0  ;;  %v560_v6 = vpop.f32.mrb[22].mxu1 }
 0x10b   :  { %v2497_v14 = vadd.f32 %v2407_v8, %v400_v13  ;;  %v1542_v17 = vpop.f32.mrb[23].mxu0  ;;  %v1638_v18 = vpop.f32.mrb[23].mxu1  ;;  %v2500_v19 = vadd.f32 %v2407_v8, %v560_v6 }
 0x10d   :  { %743 = vmax.xlane.f32.xlu0 %v2492_v12  ;;  %681 = vmax.xlane.f32.xlu1 %v2497_v14 }
 0x10e   :  { %v405_v20 = vpop.f32.mrb[24].mxu0  ;;  %v565_v23 = vpop.f32.mrb[24].mxu1 }
 0x10f   :  { %v2505_v24 = vadd.f32 %v2407_v8, %v405_v20  ;;  %v1545_v26 = vpop.f32.mrb[25].mxu0  ;;  %v1641_v27 = vpop.f32.mrb[25].mxu1  ;;  %v2508_v29 = vadd.f32 %v2407_v8, %v565_v23 }
 0x111   :  { %745 = vmax.xlane.f32.xlu1 %v2500_v19  ;;  %683 = vmax.xlane.f32.xlu0 %v2505_v24 }
 0x112   :  { %v410_v30 = vpop.f32.mrb[26].mxu0  ;;  %v570_v32 = vpop.f32.mrb[26].mxu1 }
 0x113   :  { %v2513_v33 = vadd.f32 %v2407_v8, %v410_v30  ;;  %v1548_v35 = vpop.f32.mrb[27].mxu0  ;;  %v1644_v36 = vpop.f32.mrb[27].mxu1  ;;  %v2516_v38 = vadd.f32 %v2407_v8, %v570_v32 }
 0x115   :  { %747 = vmax.xlane.f32.xlu0 %v2508_v29  ;;  %685 = vmax.xlane.f32.xlu1 %v2513_v33 }
 0x116   :  { %v415_v39 = vpop.f32.mrb[28].mxu0  ;;  %v575_v41 = vpop.f32.mrb[28].mxu1 }
 0x117   :  { %v2521_v42 = vadd.f32 %v2407_v8, %v415_v39  ;;  %v1551_v44 = vpop.f32.mrb[29].mxu0  ;;  %v1647_v45 = vpop.f32.mrb[29].mxu1  ;;  %v2524_v47 = vadd.f32 %v2407_v8, %v575_v41 }
 0x119   :  { %749 = vmax.xlane.f32.xlu1 %v2516_v38  ;;  %687 = vmax.xlane.f32.xlu0 %v2521_v42 }
 0x11a   :  { %v420_v48 = vpop.f32.mrb[30].mxu0  ;;  %v580_v50 = vpop.f32.mrb[30].mxu1 }
 0x11b   :  { %v2529_v51 = vadd.f32 %v2407_v8, %v420_v48  ;;  %v1554_v53 = vpop.f32.mrb[31].mxu0  ;;  %v1650_v54 = vpop.f32.mrb[31].mxu1  ;;  %v2532_v56 = vadd.f32 %v2407_v8, %v580_v50 }
 0x11d   :  { %751 = vmax.xlane.f32.xlu0 %v2524_v47  ;;  %689 = vmax.xlane.f32.xlu1 %v2529_v51 }
 0x11e   :  { %v425_v57 = vpop.f32.mrb[32].mxu0  ;;  %v585_v59 = vpop.f32.mrb[32].mxu1 }
 0x11f   :  { %v2537_v60 = vadd.f32 %v2407_v8, %v425_v57  ;;  %v1557_v62 = vpop.f32.mrb[33].mxu0  ;;  %v1653_v63 = vpop.f32.mrb[33].mxu1  ;;  %v2540_v1 = vadd.f32 %v2407_v8, %v585_v59 }
 0x121   :  { %753 = vmax.xlane.f32.xlu1 %v2532_v56  ;;  %691 = vmax.xlane.f32.xlu0 %v2537_v60 }
 0x122   :  { %v430_v2 = vpop.f32.mrb[34].mxu0  ;;  %v590_v4 = vpop.f32.mrb[34].mxu1 }
 0x123   :  { %v2545_v5 = vadd.f32 %v2407_v8, %v430_v2  ;;  %v1560_v9 = vpop.f32.mrb[35].mxu0  ;;  %v1656_v10 = vpop.f32.mrb[35].mxu1  ;;  %v2548_v13 = vadd.f32 %v2407_v8, %v590_v4 }
 0x125   :  { %755 = vmax.xlane.f32.xlu0 %v2540_v1  ;;  %693 = vmax.xlane.f32.xlu1 %v2545_v5 }
 0x126   :  { %v435_v6 = vpop.f32.mrb[36].mxu0  ;;  %v595_v17 = vpop.f32.mrb[36].mxu1 }
 0x127   :  { %v2553_v18 = vadd.f32 %v2407_v8, %v435_v6  ;;  %v1563_v20 = vpop.f32.mrb[37].mxu0  ;;  %v1659_v23 = vpop.f32.mrb[37].mxu1  ;;  %v2556_v26 = vadd.f32 %v2407_v8, %v595_v17 }
 0x129   :  { %757 = vmax.xlane.f32.xlu1 %v2548_v13  ;;  %695 = vmax.xlane.f32.xlu0 %v2553_v18 }
 0x12a   :  { %v440_v27 = vpop.f32.mrb[38].mxu0  ;;  %v600_v30 = vpop.f32.mrb[38].mxu1 }
 0x12b   :  { %v2561_v32 = vadd.f32 %v2407_v8, %v440_v27  ;;  %v1566_v35 = vpop.f32.mrb[39].mxu0  ;;  %v1662_v36 = vpop.f32.mrb[39].mxu1  ;;  %v2564_v39 = vadd.f32 %v2407_v8, %v600_v30 }
 0x12d   :  { %759 = vmax.xlane.f32.xlu0 %v2556_v26  ;;  %697 = vmax.xlane.f32.xlu1 %v2561_v32 }
 0x12e   :  { %v445_v41 = vpop.f32.mrb[40].mxu0  ;;  %v605_v44 = vpop.f32.mrb[40].mxu1 }
 0x12f   :  { %v2569_v45 = vadd.f32 %v2407_v8, %v445_v41  ;;  %v1569_v48 = vpop.f32.mrb[41].mxu0  ;;  %v1665_v50 = vpop.f32.mrb[41].mxu1  ;;  %v2572_v53 = vadd.f32 %v2407_v8, %v605_v44 }
 0x131   :  { %761 = vmax.xlane.f32.xlu1 %v2564_v39  ;;  %699 = vmax.xlane.f32.xlu0 %v2569_v45 }
 0x132   :  { %v450_v54 = vpop.f32.mrb[42].mxu0  ;;  %v610_v57 = vpop.f32.mrb[42].mxu1 }
 0x133   :  { %v2577_v59 = vadd.f32 %v2407_v8, %v450_v54  ;;  %v1572_v62 = vpop.f32.mrb[43].mxu0  ;;  %v1668_v63 = vpop.f32.mrb[43].mxu1  ;;  %v2580_v2 = vadd.f32 %v2407_v8, %v610_v57 }
 0x135   :  { %763 = vmax.xlane.f32.xlu0 %v2572_v53  ;;  %701 = vmax.xlane.f32.xlu1 %v2577_v59 }
 0x136   :  { %v455_v4 = vpop.f32.mrb[44].mxu0  ;;  %v615_v9 = vpop.f32.mrb[44].mxu1 }
 0x137   :  { %v2585_v10 = vadd.f32 %v2407_v8, %v455_v4  ;;  %v1575_v6 = vpop.f32.mrb[45].mxu0  ;;  %v1671_v17 = vpop.f32.mrb[45].mxu1  ;;  %v2588_v20 = vadd.f32 %v2407_v8, %v615_v9 }
 0x139   :  { %765 = vmax.xlane.f32.xlu1 %v2580_v2  ;;  %703 = vmax.xlane.f32.xlu0 %v2585_v10 }
 0x13a   :  { %v460_v23 = vpop.f32.mrb[46].mxu0  ;;  %v620_v27 = vpop.f32.mrb[46].mxu1 }
 0x13b   :  { %v2593_v30 = vadd.f32 %v2407_v8, %v460_v23  ;;  %v1578_v35 = vpop.f32.mrb[47].mxu0  ;;  %v1674_v36 = vpop.f32.mrb[47].mxu1  ;;  %v2596_v41 = vadd.f32 %v2407_v8, %v620_v27 }
 0x13d   :  { %767 = vmax.xlane.f32.xlu0 %v2588_v20  ;;  %705 = vmax.xlane.f32.xlu1 %v2593_v30 }
 0x13e   :  { %v465_v44 = vpop.f32.mrb[48].mxu0  ;;  %v625_v48 = vpop.f32.mrb[48].mxu1 }
 0x13f   :  { %v2601_v50 = vadd.f32 %v2407_v8, %v465_v44  ;;  %v1581_v54 = vpop.f32.mrb[49].mxu0  ;;  %v1677_v57 = vpop.f32.mrb[49].mxu1  ;;  %v2604_v62 = vadd.f32 %v2407_v8, %v625_v48 }
 0x141   :  { %769 = vmax.xlane.f32.xlu1 %v2596_v41  ;;  %707 = vmax.xlane.f32.xlu0 %v2601_v50 }
 0x142   :  { %v470_v63 = vpop.f32.mrb[50].mxu0  ;;  %v630_v4 = vpop.f32.mrb[50].mxu1 }
 0x143   :  { %v2609_v9 = vadd.f32 %v2407_v8, %v470_v63  ;;  %v1584_v6 = vpop.f32.mrb[51].mxu0  ;;  %v1680_v17 = vpop.f32.mrb[51].mxu1  ;;  %v2612_v23 = vadd.f32 %v2407_v8, %v630_v4 }
 0x145   :  { %3016 = vst [vmem:[#allocation5_spill] sm:$0xff] %v2609_v9  ;;  %3017 = vst [vmem:[#allocation6_spill] sm:$0xff] %v2612_v23  ;;  %771 = vmax.xlane.f32.xlu0 %v2604_v62  ;;  %709 = vmax.xlane.f32.xlu1 %v2609_v9 }
 0x146   :  { %v475_v27 = vpop.f32.mrb[52].mxu0  ;;  %v635_v35 = vpop.f32.mrb[52].mxu1 }
 0x147   :  { %v2617_v36 = vadd.f32 %v2407_v8, %v475_v27  ;;  %v1587_v44 = vpop.f32.mrb[53].mxu0  ;;  %v1683_v48 = vpop.f32.mrb[53].mxu1  ;;  %v2620_v54 = vadd.f32 %v2407_v8, %v635_v35 }
 0x149   :  { %3018 = vst [vmem:[#allocation7_spill] sm:$0xff] %v2617_v36  ;;  %3019 = vst [vmem:[#allocation8_spill] sm:$0xff] %v2620_v54  ;;  %773 = vmax.xlane.f32.xlu1 %v2612_v23  ;;  %711 = vmax.xlane.f32.xlu0 %v2617_v36 }
 0x14a   :  { %v480_v57 = vpop.f32.mrb[54].mxu0  ;;  %v640_v63 = vpop.f32.mrb[54].mxu1 }
 0x14b   :  { %v2625_v4 = vadd.f32 %v2407_v8, %v480_v57  ;;  %v1590_v6 = vpop.f32.mrb[55].mxu0  ;;  %v1686_v17 = vpop.f32.mrb[55].mxu1  ;;  %v2628_v9 = vadd.f32 %v2407_v8, %v640_v63 }
 0x14d   :  { %3020 = vst [vmem:[#allocation9_spill] sm:$0xff] %v2625_v4  ;;  %775 = vmax.xlane.f32.xlu0 %v2620_v54  ;;  %713 = vmax.xlane.f32.xlu1 %v2625_v4 }
 0x14e   :  { %v485_v27 = vpop.f32.mrb[56].mxu0  ;;  %v645_v35 = vpop.f32.mrb[56].mxu1 }
 0x14f   :  { %v2633_v44 = vadd.f32 %v2407_v8, %v485_v27  ;;  %v1593_v48 = vpop.f32.mrb[57].mxu0  ;;  %v1689_v36 = vpop.f32.mrb[57].mxu1  ;;  %v2636_v23 = vadd.f32 %v2407_v8, %v645_v35 }
 0x151   :  { %3021 = vst [vmem:[#allocation10_spill] sm:$0xff] %v2633_v44  ;;  %777 = vmax.xlane.f32.xlu1 %v2628_v9  ;;  %715 = vmax.xlane.f32.xlu0 %v2633_v44 }
 0x152   :  { %v490_v57 = vpop.f32.mrb[58].mxu0  ;;  %v650_v63 = vpop.f32.mrb[58].mxu1 }
 0x153   :  { %v2641_v6 = vadd.f32 %v2407_v8, %v490_v57  ;;  %v1596_v17 = vpop.f32.mrb[59].mxu0  ;;  %v1692_v4 = vpop.f32.mrb[59].mxu1  ;;  %v2644_v54 = vadd.f32 %v2407_v8, %v650_v63 }
 0x155   :  { %3022 = vst [vmem:[#allocation11_spill] sm:$0xff] %v2644_v54  ;;  %779 = vmax.xlane.f32.xlu0 %v2636_v23  ;;  %717 = vmax.xlane.f32.xlu1 %v2641_v6 }
 0x156   :  { %v495_v36 = vpop.f32.mrb[60].mxu0  ;;  %v655_v27 = vpop.f32.mrb[60].mxu1 }
 0x157   :  { %v2649_v35 = vadd.f32 %v2407_v8, %v495_v36  ;;  %v1599_v48 = vpop.f32.mrb[61].mxu0  ;;  %v1695_v44 = vpop.f32.mrb[61].mxu1  ;;  %v2654_v4 = vadd.f32 %v2407_v8, %v655_v27 }
 0x159   :  { %3023 = vst [vmem:[#allocation12_spill] sm:$0xff] %v2649_v35  ;;  %781 = vmax.xlane.f32.xlu1 %v2644_v54  ;;  %719 = vmax.xlane.f32.xlu0 %v2649_v35  ;;  %3024 = vst [vmem:[#allocation13_spill] sm:$0xff] %v2654_v4 }
 0x15a   :  { %v500_v57 = vpop.f32.mrb[62].mxu0 }
 0x15b   :  { %v2657_v63 = vadd.f32 %v2407_v8, %v500_v57  ;;  %v1602_v17 = vpop.f32.mrb[63].mxu0 }
 0x15d   :  { %3025 = vst [vmem:[#allocation14_spill] sm:$0xff] %v2657_v63  ;;  %783 = vmax.xlane.f32.xlu0 %v2654_v4  ;;  %721 = vmax.xlane.f32.xlu1 %v2657_v63 }
 0x16e   :  { %v660_v36 = vpop.xlane.xlu0 %659 }
 0x16f   :  { %v2662_v48 = vsub.f32 %v2410_v11, %v660_v36 }
 0x171   :  { %v848_v44 = vmul.f32 1.442695, %v2662_v48 }
 0x172   :  { %v726_v54 = vpop.xlane.xlu1 %725  ;;  %v724_v35 = vpop.xlane.xlu0 %723 }
 0x173   :  { %1712 = vpow2.f32 %v848_v44  ;;  %v2666_v27 = vsub.f32 %v2414_v15, %v724_v35  ;;  %v2670_v57 = vsub.f32 %v2417_v16, %v726_v54 }
 0x175   :  { %3026 = vst [vmem:[#allocation15_spill] sm:$0xff] %v2666_v27  ;;  %v912_v8 = vmul.f32 1.442695, %v2666_v27  ;;  %3027 = vst [vmem:[#allocation16_spill] sm:$0xff] %v2670_v57  ;;  %v914_v15 = vmul.f32 1.442695, %v2670_v57 }
 0x176   :  { %v662_v17 = vpop.xlane.xlu0 %661  ;;  %v664_v4 = vpop.xlane.xlu1 %663 }
 0x177   :  { %v2673_v63 = vsub.f32 %v2422_v21, %v662_v17  ;;  %v2676_v11 = vsub.f32 %v2425_v22, %v664_v4  ;;  %1714 = vpow2.f32 %v912_v8 }
 0x179   :  { %v850_v36 = vmul.f32 1.442695, %v2673_v63  ;;  %v852_v44 = vmul.f32 1.442695, %v2676_v11 }
 0x17a   :  { %v728_v35 = vpop.xlane.xlu0 %727  ;;  %v666_v27 = vpop.xlane.xlu1 %665 }
 0x17b   :  { %1716 = vpow2.f32 %v850_v36  ;;  %v2682_v16 = vsub.f32 %v2428_v25, %v728_v35  ;;  %v2685_v54 = vsub.f32 %v2433_v28, %v666_v27 }
 0x17c   :  { %1718 = vpow2.f32 %v852_v44 }
 0x17d   :  { %v1713_v21 = vpop.eup %1712  ;;  %v916_v22 = vmul.f32 1.442695, %v2682_v16  ;;  %1720 = vpow2.f32 %v914_v15  ;;  %v854_v17 = vmul.f32 1.442695, %v2685_v54 }
 0x17e   :  { %v730_v4 = vpop.xlane.xlu1 %729  ;;  %v668_v8 = vpop.xlane.xlu0 %667  ;;  %974 = vadd.xlane.f32.xlu1 %v1713_v21 }
 0x17f   :  { %1722 = vpow2.f32 %v916_v22  ;;  %v2690_v57 = vsub.f32 %v2436_v31, %v730_v4  ;;  %v2693_v25 = vsub.f32 %v2441_v34, %v668_v8 }
 0x180   :  { %1724 = vpow2.f32 %v854_v17 }
 0x181   :  { %3028 = vst [vmem:[#allocation17_spill] sm:$0xff] %v2690_v57  ;;  %v856_v28 = vmul.f32 1.442695, %v2693_v25  ;;  %v1715_v27 = vpop.eup %1714  ;;  %v918_v36 = vmul.f32 1.442695, %v2690_v57 }
 0x182   :  { %v732_v44 = vpop.xlane.xlu0 %731  ;;  %v670_v35 = vpop.xlane.xlu1 %669  ;;  %1038 = vadd.xlane.f32.xlu1 %v1715_v27 }
 0x183   :  { %v2698_v15 = vsub.f32 %v2444_v37, %v732_v44  ;;  %v2701_v21 = vsub.f32 %v2449_v40, %v670_v35  ;;  %1726 = vpow2.f32 %v856_v28 }
 0x184   :  { %1728 = vpow2.f32 %v918_v36 }
 0x185   :  { %v1717_v31 = vpop.eup %1716  ;;  %v920_v34 = vmul.f32 1.442695, %v2698_v15  ;;  %v858_v57 = vmul.f32 1.442695, %v2701_v21 }
 0x186   :  { %v1719_v22 = vpop.eup %1718  ;;  %v734_v4 = vpop.xlane.xlu1 %733  ;;  %976 = vadd.xlane.f32.xlu0 %v1717_v31 }
 0x187   :  { %v672_v8 = vpop.xlane.xlu0 %671  ;;  %1730 = vpow2.f32 %v920_v34  ;;  %v2706_v17 = vsub.f32 %v2452_v43, %v734_v4  ;;  %978 = vadd.xlane.f32.xlu1 %v1719_v22  ;;  %v1721_v40 = vpop.eup %1720 }
 0x188   :  { %v2709_v37 = vsub.f32 %v2457_v46, %v672_v8  ;;  %1732 = vpow2.f32 %v858_v57 }
 0x189   :  { %v1723_v28 = vpop.eup %1722  ;;  %v922_v44 = vmul.f32 1.442695, %v2706_v17 }
 0x18a   :  { %v860_v27 = vmul.f32 1.442695, %v2709_v37  ;;  %v674_v35 = vpop.xlane.xlu1 %673  ;;  %1040 = vadd.xlane.f32.xlu0 %v1721_v40  ;;  %v1725_v46 = vpop.eup %1724 }
 0x18b   :  { %v736_v36 = vpop.xlane.xlu0 %735  ;;  %v2717_v43 = vsub.f32 %v2465_v52, %v674_v35  ;;  %1042 = vadd.xlane.f32.xlu1 %v1723_v28 }
 0x18c   :  { %v2714_v31 = vsub.f32 %v2460_v49, %v736_v36  ;;  %1734 = vpow2.f32 %v860_v27 }
 0x18d   :  { %v1727_v22 = vpop.eup %1726  ;;  %1736 = vpow2.f32 %v922_v44  ;;  %v862_v40 = vmul.f32 1.442695, %v2717_v43 }
 0x18e   :  { %v924_v34 = vmul.f32 1.442695, %v2714_v31  ;;  %v738_v4 = vpop.xlane.xlu1 %737  ;;  %980 = vadd.xlane.f32.xlu0 %v1725_v46  ;;  %v1729_v52 = vpop.eup %1728 }
 0x18f   :  { %v676_v8 = vpop.xlane.xlu0 %675  ;;  %v2722_v57 = vsub.f32 %v2468_v55, %v738_v4  ;;  %982 = vadd.xlane.f32.xlu1 %v1727_v22 }
 0x190   :  { %1738 = vpow2.f32 %v924_v34  ;;  %v2725_v49 = vsub.f32 %v2473_v58, %v676_v8 }
 0x191   :  { %v1731_v28 = vpop.eup %1730  ;;  %v926_v36 = vmul.f32 1.442695, %v2722_v57  ;;  %1740 = vpow2.f32 %v862_v40 }
 0x192   :  { %v864_v27 = vmul.f32 1.442695, %v2725_v49  ;;  %v678_v35 = vpop.xlane.xlu1 %677  ;;  %1044 = vadd.xlane.f32.xlu0 %v1729_v52  ;;  %v1733_v58 = vpop.eup %1732 }
 0x193   :  { %v740_v44 = vpop.xlane.xlu0 %739  ;;  %v2733_v55 = vsub.f32 %v2481_v0, %v678_v35  ;;  %1046 = vadd.xlane.f32.xlu1 %v1731_v28 }
 0x194   :  { %v2730_v46 = vsub.f32 %v2476_v61, %v740_v44  ;;  %1742 = vpow2.f32 %v864_v27 }
 0x195   :  { %1744 = vpow2.f32 %v926_v36  ;;  %v866_v52 = vmul.f32 1.442695, %v2733_v55 }
 0x196   :  { %v928_v34 = vmul.f32 1.442695, %v2730_v46  ;;  %v1735_v22 = vpop.eup %1734  ;;  %v742_v4 = vpop.xlane.xlu1 %741  ;;  %984 = vadd.xlane.f32.xlu0 %v1733_v58 }
 0x197   :  { %v680_v8 = vpop.xlane.xlu0 %679  ;;  %v2738_v40 = vsub.f32 %v2484_v3, %v742_v4  ;;  %986 = vadd.xlane.f32.xlu1 %v1735_v22  ;;  %v1737_v0 = vpop.eup %1736 }
 0x198   :  { %1746 = vpow2.f32 %v928_v34  ;;  %v2741_v61 = vsub.f32 %v2489_v7, %v680_v8 }
 0x199   :  { %v930_v44 = vmul.f32 1.442695, %v2738_v40  ;;  %1748 = vpow2.f32 %v866_v52 }
 0x19a   :  { %v1739_v28 = vpop.eup %1738  ;;  %v868_v27 = vmul.f32 1.442695, %v2741_v61  ;;  %v682_v35 = vpop.xlane.xlu1 %681  ;;  %1048 = vadd.xlane.f32.xlu0 %v1737_v0 }
 0x19b   :  { %v744_v36 = vpop.xlane.xlu0 %743  ;;  %v2749_v3 = vsub.f32 %v2497_v14, %v682_v35  ;;  %1050 = vadd.xlane.f32.xlu1 %v1739_v28  ;;  %v1741_v7 = vpop.eup %1740 }
 0x19c   :  { %v2746_v58 = vsub.f32 %v2492_v12, %v744_v36  ;;  %1750 = vpow2.f32 %v868_v27 }
 0x19d   :  { %1752 = vpow2.f32 %v930_v44  ;;  %v870_v0 = vmul.f32 1.442695, %v2749_v3 }
 0x19e   :  { %v932_v34 = vmul.f32 1.442695, %v2746_v58  ;;  %v1743_v22 = vpop.eup %1742  ;;  %v746_v4 = vpop.xlane.xlu1 %745  ;;  %988 = vadd.xlane.f32.xlu0 %v1741_v7 }
 0x19f   :  { %v684_v8 = vpop.xlane.xlu0 %683  ;;  %v2754_v52 = vsub.f32 %v2500_v19, %v746_v4  ;;  %990 = vadd.xlane.f32.xlu1 %v1743_v22  ;;  %v1745_v14 = vpop.eup %1744 }
 0x1a0   :  { %1754 = vpow2.f32 %v932_v34  ;;  %v2757_v12 = vsub.f32 %v2505_v24, %v684_v8 }
 0x1a1   :  { %v934_v36 = vmul.f32 1.442695, %v2754_v52  ;;  %1756 = vpow2.f32 %v870_v0 }
 0x1a2   :  { %v1747_v28 = vpop.eup %1746  ;;  %v872_v27 = vmul.f32 1.442695, %v2757_v12  ;;  %v686_v35 = vpop.xlane.xlu1 %685  ;;  %1052 = vadd.xlane.f32.xlu0 %v1745_v14 }
 0x1a3   :  { %v748_v44 = vpop.xlane.xlu0 %747  ;;  %v2765_v19 = vsub.f32 %v2513_v33, %v686_v35  ;;  %1054 = vadd.xlane.f32.xlu1 %v1747_v28  ;;  %v1749_v24 = vpop.eup %1748 }
 0x1a4   :  { %v2762_v7 = vsub.f32 %v2508_v29, %v748_v44  ;;  %1758 = vpow2.f32 %v872_v27 }
 0x1a5   :  { %1760 = vpow2.f32 %v934_v36  ;;  %v874_v14 = vmul.f32 1.442695, %v2765_v19 }
 0x1a6   :  { %v936_v34 = vmul.f32 1.442695, %v2762_v7  ;;  %v1751_v22 = vpop.eup %1750  ;;  %v750_v4 = vpop.xlane.xlu1 %749  ;;  %992 = vadd.xlane.f32.xlu0 %v1749_v24 }
 0x1a7   :  { %v688_v8 = vpop.xlane.xlu0 %687  ;;  %v2770_v0 = vsub.f32 %v2516_v38, %v750_v4  ;;  %994 = vadd.xlane.f32.xlu1 %v1751_v22  ;;  %v1753_v33 = vpop.eup %1752 }
 0x1a8   :  { %1762 = vpow2.f32 %v936_v34  ;;  %v2773_v29 = vsub.f32 %v2521_v42, %v688_v8 }
 0x1a9   :  { %v938_v44 = vmul.f32 1.442695, %v2770_v0  ;;  %1764 = vpow2.f32 %v874_v14 }
 0x1aa   :  { %v1755_v28 = vpop.eup %1754  ;;  %v876_v27 = vmul.f32 1.442695, %v2773_v29  ;;  %v690_v35 = vpop.xlane.xlu1 %689  ;;  %1056 = vadd.xlane.f32.xlu0 %v1753_v33 }
 0x1ab   :  { %v752_v36 = vpop.xlane.xlu0 %751  ;;  %v2781_v38 = vsub.f32 %v2529_v51, %v690_v35  ;;  %1058 = vadd.xlane.f32.xlu1 %v1755_v28  ;;  %v1757_v42 = vpop.eup %1756 }
 0x1ac   :  { %v2778_v24 = vsub.f32 %v2524_v47, %v752_v36  ;;  %1766 = vpow2.f32 %v876_v27 }
 0x1ad   :  { %1768 = vpow2.f32 %v938_v44  ;;  %v878_v33 = vmul.f32 1.442695, %v2781_v38 }
 0x1ae   :  { %v940_v34 = vmul.f32 1.442695, %v2778_v24  ;;  %v1759_v22 = vpop.eup %1758  ;;  %v754_v4 = vpop.xlane.xlu1 %753  ;;  %996 = vadd.xlane.f32.xlu0 %v1757_v42 }
 0x1af   :  { %v692_v8 = vpop.xlane.xlu0 %691  ;;  %v2786_v14 = vsub.f32 %v2532_v56, %v754_v4  ;;  %998 = vadd.xlane.f32.xlu1 %v1759_v22  ;;  %v1761_v51 = vpop.eup %1760 }
 0x1b0   :  { %1770 = vpow2.f32 %v940_v34  ;;  %v2789_v47 = vsub.f32 %v2537_v60, %v692_v8 }
 0x1b1   :  { %v942_v36 = vmul.f32 1.442695, %v2786_v14  ;;  %1772 = vpow2.f32 %v878_v33 }
 0x1b2   :  { %v1763_v28 = vpop.eup %1762  ;;  %v880_v27 = vmul.f32 1.442695, %v2789_v47  ;;  %v694_v35 = vpop.xlane.xlu1 %693  ;;  %1060 = vadd.xlane.f32.xlu0 %v1761_v51 }
 0x1b3   :  { %v756_v44 = vpop.xlane.xlu0 %755  ;;  %v2797_v56 = vsub.f32 %v2545_v5, %v694_v35  ;;  %1062 = vadd.xlane.f32.xlu1 %v1763_v28  ;;  %v1765_v60 = vpop.eup %1764 }
 0x1b4   :  { %v2794_v42 = vsub.f32 %v2540_v1, %v756_v44  ;;  %1774 = vpow2.f32 %v880_v27 }
 0x1b5   :  { %1776 = vpow2.f32 %v942_v36  ;;  %v882_v51 = vmul.f32 1.442695, %v2797_v56 }
 0x1b6   :  { %v944_v34 = vmul.f32 1.442695, %v2794_v42  ;;  %v1767_v22 = vpop.eup %1766  ;;  %v758_v4 = vpop.xlane.xlu1 %757  ;;  %1000 = vadd.xlane.f32.xlu0 %v1765_v60 }
 0x1b7   :  { %v696_v8 = vpop.xlane.xlu0 %695  ;;  %v2802_v33 = vsub.f32 %v2548_v13, %v758_v4  ;;  %1002 = vadd.xlane.f32.xlu1 %v1767_v22  ;;  %v1769_v5 = vpop.eup %1768 }
 0x1b8   :  { %1778 = vpow2.f32 %v944_v34  ;;  %v2805_v1 = vsub.f32 %v2553_v18, %v696_v8 }
 0x1b9   :  { %v946_v44 = vmul.f32 1.442695, %v2802_v33  ;;  %1780 = vpow2.f32 %v882_v51 }
 0x1ba   :  { %v1771_v28 = vpop.eup %1770  ;;  %v884_v27 = vmul.f32 1.442695, %v2805_v1  ;;  %v698_v35 = vpop.xlane.xlu1 %697  ;;  %1064 = vadd.xlane.f32.xlu0 %v1769_v5 }
 0x1bb   :  { %v760_v36 = vpop.xlane.xlu0 %759  ;;  %v2813_v13 = vsub.f32 %v2561_v32, %v698_v35  ;;  %1066 = vadd.xlane.f32.xlu1 %v1771_v28  ;;  %v1773_v18 = vpop.eup %1772 }
 0x1bc   :  { %v2810_v60 = vsub.f32 %v2556_v26, %v760_v36  ;;  %1782 = vpow2.f32 %v884_v27 }
 0x1bd   :  { %1784 = vpow2.f32 %v946_v44  ;;  %v886_v5 = vmul.f32 1.442695, %v2813_v13 }
 0x1be   :  { %v948_v34 = vmul.f32 1.442695, %v2810_v60  ;;  %v1775_v22 = vpop.eup %1774  ;;  %v762_v4 = vpop.xlane.xlu1 %761  ;;  %1004 = vadd.xlane.f32.xlu0 %v1773_v18 }
 0x1bf   :  { %v700_v8 = vpop.xlane.xlu0 %699  ;;  %v2818_v51 = vsub.f32 %v2564_v39, %v762_v4  ;;  %1006 = vadd.xlane.f32.xlu1 %v1775_v22  ;;  %v1777_v32 = vpop.eup %1776 }
 0x1c0   :  { %1786 = vpow2.f32 %v948_v34  ;;  %v2821_v26 = vsub.f32 %v2569_v45, %v700_v8 }
 0x1c1   :  { %v950_v36 = vmul.f32 1.442695, %v2818_v51  ;;  %1788 = vpow2.f32 %v886_v5 }
 0x1c2   :  { %v1779_v28 = vpop.eup %1778  ;;  %v888_v27 = vmul.f32 1.442695, %v2821_v26  ;;  %v702_v35 = vpop.xlane.xlu1 %701  ;;  %1068 = vadd.xlane.f32.xlu0 %v1777_v32 }
 0x1c3   :  { %v764_v44 = vpop.xlane.xlu0 %763  ;;  %v2829_v39 = vsub.f32 %v2577_v59, %v702_v35  ;;  %1070 = vadd.xlane.f32.xlu1 %v1779_v28  ;;  %v1781_v45 = vpop.eup %1780 }
 0x1c4   :  { %v2826_v18 = vsub.f32 %v2572_v53, %v764_v44  ;;  %1790 = vpow2.f32 %v888_v27 }
 0x1c5   :  { %1792 = vpow2.f32 %v950_v36  ;;  %v890_v32 = vmul.f32 1.442695, %v2829_v39 }
 0x1c6   :  { %v952_v34 = vmul.f32 1.442695, %v2826_v18  ;;  %v1783_v22 = vpop.eup %1782  ;;  %v766_v4 = vpop.xlane.xlu1 %765  ;;  %1008 = vadd.xlane.f32.xlu0 %v1781_v45 }
 0x1c7   :  { %v704_v8 = vpop.xlane.xlu0 %703  ;;  %v2834_v5 = vsub.f32 %v2580_v2, %v766_v4  ;;  %1010 = vadd.xlane.f32.xlu1 %v1783_v22  ;;  %v1785_v59 = vpop.eup %1784 }
 0x1c8   :  { %1794 = vpow2.f32 %v952_v34  ;;  %v2837_v53 = vsub.f32 %v2585_v10, %v704_v8 }
 0x1c9   :  { %v954_v44 = vmul.f32 1.442695, %v2834_v5  ;;  %1796 = vpow2.f32 %v890_v32 }
 0x1ca   :  { %v1787_v28 = vpop.eup %1786  ;;  %v892_v27 = vmul.f32 1.442695, %v2837_v53  ;;  %v706_v35 = vpop.xlane.xlu1 %705  ;;  %1072 = vadd.xlane.f32.xlu0 %v1785_v59 }
 0x1cb   :  { %v768_v36 = vpop.xlane.xlu0 %767  ;;  %v2845_v2 = vsub.f32 %v2593_v30, %v706_v35  ;;  %1074 = vadd.xlane.f32.xlu1 %v1787_v28  ;;  %v1789_v10 = vpop.eup %1788 }
 0x1cc   :  { %v2842_v45 = vsub.f32 %v2588_v20, %v768_v36  ;;  %1798 = vpow2.f32 %v892_v27 }
 0x1cd   :  { %1800 = vpow2.f32 %v954_v44  ;;  %v894_v59 = vmul.f32 1.442695, %v2845_v2 }
 0x1ce   :  { %v956_v34 = vmul.f32 1.442695, %v2842_v45  ;;  %v1791_v22 = vpop.eup %1790  ;;  %v770_v4 = vpop.xlane.xlu1 %769  ;;  %1012 = vadd.xlane.f32.xlu0 %v1789_v10 }
 0x1cf   :  { %v708_v8 = vpop.xlane.xlu0 %707  ;;  %v2850_v32 = vsub.f32 %v2596_v41, %v770_v4  ;;  %1014 = vadd.xlane.f32.xlu1 %v1791_v22  ;;  %v1793_v30 = vpop.eup %1792 }
 0x1d0   :  { %1802 = vpow2.f32 %v956_v34  ;;  %v2853_v20 = vsub.f32 %v2601_v50, %v708_v8  ;;  %v3032_v34 = vld [vmem:[#allocation5_spill] sm:$0xff] }
 0x1d1   :  { %3029 = vst [vmem:[#allocation18_spill] sm:$0xff] %v2850_v32  ;;  %v958_v36 = vmul.f32 1.442695, %v2850_v32  ;;  %1804 = vpow2.f32 %v894_v59  ;;  %v3034_v59 = vld [vmem:[#allocation6_spill] sm:$0xff] }
 0x1d2   :  { %3030 = vst [vmem:[#allocation19_spill] sm:$0xff] %v2853_v20  ;;  %v1795_v28 = vpop.eup %1794  ;;  %v896_v27 = vmul.f32 1.442695, %v2853_v20  ;;  %v710_v35 = vpop.xlane.xlu1 %709  ;;  %1076 = vadd.xlane.f32.xlu0 %v1793_v30 }
 0x1d3   :  { %v772_v44 = vpop.xlane.xlu0 %771  ;;  %v2861_v41 = vsub.f32 %v3032_v34, %v710_v35  ;;  %1078 = vadd.xlane.f32.xlu1 %v1795_v28  ;;  %v1797_v50 = vpop.eup %1796 }
 0x1d4   :  { %v2858_v10 = vsub.f32 %v2604_v62, %v772_v44  ;;  %1806 = vpow2.f32 %v896_v27  ;;  %v3035_v62 = vld [vmem:[#allocation7_spill] sm:$0xff] }
 0x1d5   :  { %3033 = vst [vmem:[#allocation5_spill] sm:$0xff] %v2861_v41  ;;  %1808 = vpow2.f32 %v958_v36  ;;  %v898_v30 = vmul.f32 1.442695, %v2861_v41  ;;  %v3039_v41 = vld [vmem:[#allocation9_spill] sm:$0xff] }
 0x1d6   :  { %3031 = vst [vmem:[#allocation20_spill] sm:$0xff] %v2858_v10  ;;  %v960_v22 = vmul.f32 1.442695, %v2858_v10  ;;  %v1799_v4 = vpop.eup %1798  ;;  %v774_v8 = vpop.xlane.xlu1 %773  ;;  %1016 = vadd.xlane.f32.xlu0 %v1797_v50  ;;  %v3037_v50 = vld [vmem:[#allocation8_spill] sm:$0xff] }
 0x1d7   :  { %v712_v20 = vpop.xlane.xlu0 %711  ;;  %v2866_v32 = vsub.f32 %v3034_v59, %v774_v8  ;;  %1018 = vadd.xlane.f32.xlu1 %v1799_v4  ;;  %v1801_v28 = vpop.eup %1800 }
 0x1d8   :  { %1810 = vpow2.f32 %v960_v22  ;;  %v2869_v44 = vsub.f32 %v3035_v62, %v712_v20 }
 0x1d9   :  { %v962_v34 = vmul.f32 1.442695, %v2866_v32  ;;  %1812 = vpow2.f32 %v898_v30 }
 0x1da   :  { %3036 = vst [vmem:[#allocation6_spill] sm:$0xff] %v2869_v44  ;;  %v1803_v27 = vpop.eup %1802  ;;  %v900_v35 = vmul.f32 1.442695, %v2869_v44  ;;  %v714_v10 = vpop.xlane.xlu1 %713  ;;  %1080 = vadd.xlane.f32.xlu0 %v1801_v28 }
 0x1db   :  { %v776_v36 = vpop.xlane.xlu0 %775  ;;  %v2877_v8 = vsub.f32 %v3039_v41, %v714_v10  ;;  %1082 = vadd.xlane.f32.xlu1 %v1803_v27  ;;  %v1805_v20 = vpop.eup %1804 }
 0x1dc   :  { %v2874_v22 = vsub.f32 %v3037_v50, %v776_v36  ;;  %1814 = vpow2.f32 %v900_v35  ;;  %v3041_v36 = vld [vmem:[#allocation10_spill] sm:$0xff] }
 0x1dd   :  { %1816 = vpow2.f32 %v962_v34  ;;  %v902_v28 = vmul.f32 1.442695, %v2877_v8 }
 0x1de   :  { %3038 = vst [vmem:[#allocation7_spill] sm:$0xff] %v2874_v22  ;;  %v964_v4 = vmul.f32 1.442695, %v2874_v22  ;;  %v1807_v59 = vpop.eup %1806  ;;  %v778_v62 = vpop.xlane.xlu1 %777  ;;  %1020 = vadd.xlane.f32.xlu0 %v1805_v20 }
 0x1df   :  { %v716_v44 = vpop.xlane.xlu0 %715  ;;  %v2882_v30 = vsub.f32 %v2628_v9, %v778_v62  ;;  %1022 = vadd.xlane.f32.xlu1 %v1807_v59  ;;  %v1809_v10 = vpop.eup %1808 }
 0x1e0   :  { %1818 = vpow2.f32 %v964_v4  ;;  %v2885_v50 = vsub.f32 %v3041_v36, %v716_v44 }
 0x1e1   :  { %3040 = vst [vmem:[#allocation8_spill] sm:$0xff] %v2882_v30  ;;  %v966_v35 = vmul.f32 1.442695, %v2882_v30  ;;  %1820 = vpow2.f32 %v902_v28  ;;  %v3044_v28 = vld [vmem:[#allocation12_spill] sm:$0xff] }
 0x1e2   :  { %v1811_v41 = vpop.eup %1810  ;;  %v904_v27 = vmul.f32 1.442695, %v2885_v50  ;;  %v718_v22 = vpop.xlane.xlu1 %717  ;;  %1084 = vadd.xlane.f32.xlu0 %v1809_v10 }
 0x1e3   :  { %v780_v34 = vpop.xlane.xlu0 %779  ;;  %v2893_v9 = vsub.f32 %v2641_v6, %v718_v22  ;;  %1086 = vadd.xlane.f32.xlu1 %v1811_v41  ;;  %v1813_v44 = vpop.eup %1812 }
 0x1e4   :  { %v2890_v20 = vsub.f32 %v2636_v23, %v780_v34  ;;  %1822 = vpow2.f32 %v904_v27  ;;  %v3045_v34 = vld [vmem:[#allocation13_spill] sm:$0xff] }
 0x1e5   :  { %3043 = vst [vmem:[#allocation10_spill] sm:$0xff] %v2893_v9  ;;  %1824 = vpow2.f32 %v966_v35  ;;  %v906_v10 = vmul.f32 1.442695, %v2893_v9  ;;  %v3048_v9 = vld [vmem:[#allocation11_spill] sm:$0xff] }
 0x1e6   :  { %3042 = vst [vmem:[#allocation9_spill] sm:$0xff] %v2890_v20  ;;  %v968_v4 = vmul.f32 1.442695, %v2890_v20  ;;  %v1815_v59 = vpop.eup %1814  ;;  %v782_v62 = vpop.xlane.xlu1 %781  ;;  %1024 = vadd.xlane.f32.xlu0 %v1813_v44  ;;  %v3047_v44 = vld [vmem:[#allocation14_spill] sm:$0xff] }
 0x1e7   :  { %v720_v36 = vpop.xlane.xlu0 %719  ;;  %1026 = vadd.xlane.f32.xlu1 %v1815_v59  ;;  %v1817_v23 = vpop.eup %1816  ;;  %v2908_v20 = vsub.f32 %v3048_v9, %v782_v62 }
 0x1e8   :  { %1826 = vpow2.f32 %v968_v4  ;;  %v2898_v30 = vsub.f32 %v3044_v28, %v720_v36 }
 0x1e9   :  { %1828 = vpow2.f32 %v906_v10  ;;  %3049 = vst [vmem:[#allocation13_spill] sm:$0xff] %v2908_v20 }
 0x1ea   :  { %v1819_v6 = vpop.eup %1818  ;;  %v908_v22 = vmul.f32 1.442695, %v2898_v30  ;;  %1088 = vadd.xlane.f32.xlu0 %v1817_v23  ;;  %v722_v27 = vpop.xlane.xlu1 %721 }
 0x1eb   :  { %v784_v41 = vpop.xlane.xlu0 %783  ;;  %1090 = vadd.xlane.f32.xlu1 %v1819_v6  ;;  %v2905_v4 = vsub.f32 %v3047_v44, %v722_v27  ;;  %v1821_v59 = vpop.eup %1820 }
 0x1ec   :  { %v2902_v35 = vsub.f32 %v3045_v34, %v784_v41  ;;  %1830 = vpow2.f32 %v908_v22  ;;  %v970_v41 = vmul.f32 1.442695, %v2908_v20 }
 0x1ed   :  { %v910_v28 = vmul.f32 1.442695, %v2905_v4 }
 0x1ee   :  { %3046 = vst [vmem:[#allocation12_spill] sm:$0xff] %v2902_v35  ;;  %v972_v36 = vmul.f32 1.442695, %v2902_v35  ;;  %v1823_v23 = vpop.eup %1822  ;;  %1028 = vadd.xlane.f32.xlu0 %v1821_v59 }
 0x1ef   :  { %1030 = vadd.xlane.f32.xlu1 %v1823_v23  ;;  %v1825_v10 = vpop.eup %1824 }
 0x1f0   :  { %1832 = vpow2.f32 %v972_v36 }
 0x1f1   :  { %1834 = vpow2.f32 %v910_v28 }
 0x1f2   :  { %v1827_v6 = vpop.eup %1826  ;;  %1092 = vadd.xlane.f32.xlu0 %v1825_v10  ;;  %1836 = vpow2.f32 %v970_v41 }
 0x1f3   :  { %1094 = vadd.xlane.f32.xlu1 %v1827_v6  ;;  %v1829_v9 = vpop.eup %1828 }
 0x1f6   :  { %v1831_v62 = vpop.eup %1830  ;;  %1032 = vadd.xlane.f32.xlu0 %v1829_v9 }
 0x1f7   :  { %1034 = vadd.xlane.f32.xlu1 %v1831_v62 }
 0x1fa   :  { %v1833_v22 = vpop.eup %1832 }
 0x1fb   :  { %v1835_v27 = vpop.eup %1834  ;;  %1098 = vadd.xlane.f32.xlu1 %v1833_v22 }
 0x1fc   :  { %1036 = vadd.xlane.f32.xlu0 %v1835_v27  ;;  %v1837_v34 = vpop.eup %1836 }
 0x200   :  { %1096 = vadd.xlane.f32.xlu0 %v1837_v34 }
 0x20b   :  { %v975_v44 = vpop.xlane.xlu1 %974 }
 0x20c   :  { %1838 = vlog2.f32 %v975_v44 }
 0x20f   :  { %v1039_v59 = vpop.xlane.xlu1 %1038 }
 0x210   :  { %1840 = vlog2.f32 %v1039_v59  ;;  %v3050_v59 = vld [vmem:[#allocation15_spill] sm:$0xff] }
 0x213   :  { %v977_v36 = vpop.xlane.xlu0 %976 }
 0x214   :  { %1842 = vlog2.f32 %v977_v36  ;;  %v979_v28 = vpop.xlane.xlu1 %978 }
 0x215   :  { %1844 = vlog2.f32 %v979_v28 }
 0x216   :  { %v1839_v23 = vpop.eup %1838 }
 0x217   :  { %v1101_v10 = vmul.f32 0.6931472, %v1839_v23  ;;  %v1041_v41 = vpop.xlane.xlu0 %1040 }
 0x218   :  { %1846 = vlog2.f32 %v1041_v41  ;;  %v1043_v6 = vpop.xlane.xlu1 %1042 }
 0x219   :  { %v1226_v9 = vsub.f32 %v2662_v48, %v1101_v10  ;;  %1848 = vlog2.f32 %v1043_v6 }
 0x21a   :  { %v1841_v62 = vpop.eup %1840 }
 0x21b   :  { %1289 = vst [vmem:[#allocation2] sm:$0xff] %v1226_v9  ;;  %v981_v22 = vpop.xlane.xlu0 %980  ;;  %v1165_v27 = vmul.f32 0.6931472, %v1841_v62 }
 0x21c   :  { %1850 = vlog2.f32 %v981_v22  ;;  %v983_v34 = vpop.xlane.xlu1 %982 }
 0x21d   :  { %1852 = vlog2.f32 %v983_v34  ;;  %v1258_v36 = vsub.f32 %v3050_v59, %v1165_v27 }
 0x21e   :  { %v1843_v44 = vpop.eup %1842 }
 0x21f   :  { %v1845_v20 = vpop.eup %1844  ;;  %v1103_v28 = vmul.f32 0.6931472, %v1843_v44  ;;  %v1045_v35 = vpop.xlane.xlu0 %1044  ;;  %1321 = vst [vmem:[#allocation2 + $0x100] sm:$0xff] %v1258_v36  ;;  %v3051_v44 = vld [vmem:[#allocation16_spill] sm:$0xff] }
 0x220   :  { %v1105_v23 = vmul.f32 0.6931472, %v1845_v20  ;;  %1854 = vlog2.f32 %v1045_v35  ;;  %v1047_v41 = vpop.xlane.xlu1 %1046 }
 0x221   :  { %v1227_v48 = vsub.f32 %v2673_v63, %v1103_v28  ;;  %1856 = vlog2.f32 %v1047_v41 }
 0x222   :  { %v1847_v10 = vpop.eup %1846  ;;  %v1228_v6 = vsub.f32 %v2676_v11, %v1105_v23 }
 0x223   :  { %v1849_v9 = vpop.eup %1848  ;;  %1290 = vst [vmem:[#allocation2 + $0x8] sm:$0xff] %v1227_v48  ;;  %v1167_v62 = vmul.f32 0.6931472, %v1847_v10  ;;  %v985_v22 = vpop.xlane.xlu0 %984 }
 0x224   :  { %1291 = vst [vmem:[#allocation2 + $0x10] sm:$0xff] %v1228_v6  ;;  %v1169_v34 = vmul.f32 0.6931472, %v1849_v9  ;;  %1858 = vlog2.f32 %v985_v22  ;;  %v987_v27 = vpop.xlane.xlu1 %986 }
 0x225   :  { %v1259_v59 = vsub.f32 %v3051_v44, %v1167_v62  ;;  %1860 = vlog2.f32 %v987_v27 }
 0x226   :  { %v1851_v20 = vpop.eup %1850  ;;  %v1260_v35 = vsub.f32 %v2682_v16, %v1169_v34  ;;  %v3052_v34 = vld [vmem:[#allocation17_spill] sm:$0xff] }
 0x227   :  { %v1853_v36 = vpop.eup %1852  ;;  %1322 = vst [vmem:[#allocation2 + $0x108] sm:$0xff] %v1259_v59  ;;  %v1107_v63 = vmul.f32 0.6931472, %v1851_v20  ;;  %v1049_v28 = vpop.xlane.xlu0 %1048 }
 0x228   :  { %1323 = vst [vmem:[#allocation2 + $0x110] sm:$0xff] %v1260_v35  ;;  %v1109_v11 = vmul.f32 0.6931472, %v1853_v36  ;;  %1862 = vlog2.f32 %v1049_v28  ;;  %v1051_v23 = vpop.xlane.xlu1 %1050 }
 0x229   :  { %v1229_v41 = vsub.f32 %v2685_v54, %v1107_v63  ;;  %1864 = vlog2.f32 %v1051_v23 }
 0x22a   :  { %v1855_v48 = vpop.eup %1854  ;;  %v1230_v10 = vsub.f32 %v2693_v25, %v1109_v11 }
 0x22b   :  { %v1857_v6 = vpop.eup %1856  ;;  %1292 = vst [vmem:[#allocation2 + $0x18] sm:$0xff] %v1229_v41  ;;  %v1171_v9 = vmul.f32 0.6931472, %v1855_v48  ;;  %v989_v62 = vpop.xlane.xlu0 %988 }
 0x22c   :  { %1293 = vst [vmem:[#allocation2 + $0x20] sm:$0xff] %v1230_v10  ;;  %v1173_v16 = vmul.f32 0.6931472, %v1857_v6  ;;  %1866 = vlog2.f32 %v989_v62  ;;  %v991_v22 = vpop.xlane.xlu1 %990 }
 0x22d   :  { %v1261_v27 = vsub.f32 %v3052_v34, %v1171_v9  ;;  %1868 = vlog2.f32 %v991_v22 }
 0x22e   :  { %v1859_v44 = vpop.eup %1858  ;;  %v1262_v59 = vsub.f32 %v2698_v15, %v1173_v16 }
 0x22f   :  { %v1861_v20 = vpop.eup %1860  ;;  %1324 = vst [vmem:[#allocation2 + $0x118] sm:$0xff] %v1261_v27  ;;  %v1111_v54 = vmul.f32 0.6931472, %v1859_v44  ;;  %v1053_v35 = vpop.xlane.xlu0 %1052 }
 0x230   :  { %1325 = vst [vmem:[#allocation2 + $0x120] sm:$0xff] %v1262_v59  ;;  %v1113_v25 = vmul.f32 0.6931472, %v1861_v20  ;;  %1870 = vlog2.f32 %v1053_v35  ;;  %v1055_v36 = vpop.xlane.xlu1 %1054 }
 0x231   :  { %v1231_v63 = vsub.f32 %v2701_v21, %v1111_v54  ;;  %1872 = vlog2.f32 %v1055_v36 }
 0x232   :  { %v1863_v28 = vpop.eup %1862  ;;  %v1232_v11 = vsub.f32 %v2709_v37, %v1113_v25 }
 0x233   :  { %v1865_v23 = vpop.eup %1864  ;;  %1294 = vst [vmem:[#allocation2 + $0x28] sm:$0xff] %v1231_v63  ;;  %v1175_v41 = vmul.f32 0.6931472, %v1863_v28  ;;  %v993_v48 = vpop.xlane.xlu0 %992 }
 0x234   :  { %1295 = vst [vmem:[#allocation2 + $0x30] sm:$0xff] %v1232_v11  ;;  %v1177_v15 = vmul.f32 0.6931472, %v1865_v23  ;;  %1874 = vlog2.f32 %v993_v48  ;;  %v995_v10 = vpop.xlane.xlu1 %994 }
 0x235   :  { %v1263_v6 = vsub.f32 %v2706_v17, %v1175_v41  ;;  %1876 = vlog2.f32 %v995_v10 }
 0x236   :  { %v1867_v9 = vpop.eup %1866  ;;  %v1264_v62 = vsub.f32 %v2714_v31, %v1177_v15 }
 0x237   :  { %v1869_v16 = vpop.eup %1868  ;;  %1326 = vst [vmem:[#allocation2 + $0x128] sm:$0xff] %v1263_v6  ;;  %v1115_v21 = vmul.f32 0.6931472, %v1867_v9  ;;  %v1057_v22 = vpop.xlane.xlu0 %1056 }
 0x238   :  { %1327 = vst [vmem:[#allocation2 + $0x130] sm:$0xff] %v1264_v62  ;;  %v1117_v37 = vmul.f32 0.6931472, %v1869_v16  ;;  %1878 = vlog2.f32 %v1057_v22  ;;  %v1059_v34 = vpop.xlane.xlu1 %1058 }
 0x239   :  { %v1233_v27 = vsub.f32 %v2717_v43, %v1115_v21  ;;  %1880 = vlog2.f32 %v1059_v34 }
 0x23a   :  { %v1871_v44 = vpop.eup %1870  ;;  %v1234_v59 = vsub.f32 %v2725_v49, %v1117_v37 }
 0x23b   :  { %v1873_v20 = vpop.eup %1872  ;;  %1296 = vst [vmem:[#allocation2 + $0x38] sm:$0xff] %v1233_v27  ;;  %v1179_v17 = vmul.f32 0.6931472, %v1871_v44  ;;  %v997_v54 = vpop.xlane.xlu0 %996 }
 0x23c   :  { %1297 = vst [vmem:[#allocation2 + $0x40] sm:$0xff] %v1234_v59  ;;  %v1181_v31 = vmul.f32 0.6931472, %v1873_v20  ;;  %1882 = vlog2.f32 %v997_v54  ;;  %v999_v35 = vpop.xlane.xlu1 %998 }
 0x23d   :  { %v1265_v25 = vsub.f32 %v2722_v57, %v1179_v17  ;;  %1884 = vlog2.f32 %v999_v35 }
 0x23e   :  { %v1875_v36 = vpop.eup %1874  ;;  %v1266_v63 = vsub.f32 %v2730_v46, %v1181_v31 }
 0x23f   :  { %v1877_v28 = vpop.eup %1876  ;;  %1328 = vst [vmem:[#allocation2 + $0x138] sm:$0xff] %v1265_v25  ;;  %v1119_v43 = vmul.f32 0.6931472, %v1875_v36  ;;  %v1061_v11 = vpop.xlane.xlu0 %1060 }
 0x240   :  { %1329 = vst [vmem:[#allocation2 + $0x140] sm:$0xff] %v1266_v63  ;;  %v1121_v49 = vmul.f32 0.6931472, %v1877_v28  ;;  %1886 = vlog2.f32 %v1061_v11  ;;  %v1063_v23 = vpop.xlane.xlu1 %1062 }
 0x241   :  { %v1235_v41 = vsub.f32 %v2733_v55, %v1119_v43  ;;  %1888 = vlog2.f32 %v1063_v23 }
 0x242   :  { %v1879_v48 = vpop.eup %1878  ;;  %v1236_v15 = vsub.f32 %v2741_v61, %v1121_v49 }
 0x243   :  { %v1881_v10 = vpop.eup %1880  ;;  %1298 = vst [vmem:[#allocation2 + $0x48] sm:$0xff] %v1235_v41  ;;  %v1183_v57 = vmul.f32 0.6931472, %v1879_v48  ;;  %v1001_v6 = vpop.xlane.xlu0 %1000 }
 0x244   :  { %1299 = vst [vmem:[#allocation2 + $0x50] sm:$0xff] %v1236_v15  ;;  %v1185_v46 = vmul.f32 0.6931472, %v1881_v10  ;;  %1890 = vlog2.f32 %v1001_v6  ;;  %v1003_v9 = vpop.xlane.xlu1 %1002 }
 0x245   :  { %v1267_v62 = vsub.f32 %v2738_v40, %v1183_v57  ;;  %1892 = vlog2.f32 %v1003_v9 }
 0x246   :  { %v1883_v16 = vpop.eup %1882  ;;  %v1268_v21 = vsub.f32 %v2746_v58, %v1185_v46 }
 0x247   :  { %v1885_v22 = vpop.eup %1884  ;;  %1330 = vst [vmem:[#allocation2 + $0x148] sm:$0xff] %v1267_v62  ;;  %v1123_v55 = vmul.f32 0.6931472, %v1883_v16  ;;  %v1065_v37 = vpop.xlane.xlu0 %1064 }
 0x248   :  { %1331 = vst [vmem:[#allocation2 + $0x150] sm:$0xff] %v1268_v21  ;;  %v1125_v61 = vmul.f32 0.6931472, %v1885_v22  ;;  %1894 = vlog2.f32 %v1065_v37  ;;  %v1067_v34 = vpop.xlane.xlu1 %1066 }
 0x249   :  { %v1237_v27 = vsub.f32 %v2749_v3, %v1123_v55  ;;  %1896 = vlog2.f32 %v1067_v34 }
 0x24a   :  { %v1887_v44 = vpop.eup %1886  ;;  %v1238_v59 = vsub.f32 %v2757_v12, %v1125_v61 }
 0x24b   :  { %v1889_v20 = vpop.eup %1888  ;;  %1300 = vst [vmem:[#allocation2 + $0x58] sm:$0xff] %v1237_v27  ;;  %v1187_v40 = vmul.f32 0.6931472, %v1887_v44  ;;  %v1005_v17 = vpop.xlane.xlu0 %1004 }
 0x24c   :  { %1301 = vst [vmem:[#allocation2 + $0x60] sm:$0xff] %v1238_v59  ;;  %v1189_v58 = vmul.f32 0.6931472, %v1889_v20  ;;  %1898 = vlog2.f32 %v1005_v17  ;;  %v1007_v54 = vpop.xlane.xlu1 %1006 }
 0x24d   :  { %v1269_v31 = vsub.f32 %v2754_v52, %v1187_v40  ;;  %1900 = vlog2.f32 %v1007_v54 }
 0x24e   :  { %v1891_v35 = vpop.eup %1890  ;;  %v1270_v25 = vsub.f32 %v2762_v7, %v1189_v58 }
 0x24f   :  { %v1893_v36 = vpop.eup %1892  ;;  %1332 = vst [vmem:[#allocation2 + $0x158] sm:$0xff] %v1269_v31  ;;  %v1127_v3 = vmul.f32 0.6931472, %v1891_v35  ;;  %v1069_v63 = vpop.xlane.xlu0 %1068 }
 0x250   :  { %1333 = vst [vmem:[#allocation2 + $0x160] sm:$0xff] %v1270_v25  ;;  %v1129_v12 = vmul.f32 0.6931472, %v1893_v36  ;;  %1902 = vlog2.f32 %v1069_v63  ;;  %v1071_v28 = vpop.xlane.xlu1 %1070 }
 0x251   :  { %v1239_v43 = vsub.f32 %v2765_v19, %v1127_v3  ;;  %1904 = vlog2.f32 %v1071_v28 }
 0x252   :  { %v1895_v11 = vpop.eup %1894  ;;  %v1240_v49 = vsub.f32 %v2773_v29, %v1129_v12 }
 0x253   :  { %v1897_v23 = vpop.eup %1896  ;;  %1302 = vst [vmem:[#allocation2 + $0x68] sm:$0xff] %v1239_v43  ;;  %v1191_v52 = vmul.f32 0.6931472, %v1895_v11  ;;  %v1009_v41 = vpop.xlane.xlu0 %1008 }
 0x254   :  { %1303 = vst [vmem:[#allocation2 + $0x70] sm:$0xff] %v1240_v49  ;;  %v1193_v7 = vmul.f32 0.6931472, %v1897_v23  ;;  %1906 = vlog2.f32 %v1009_v41  ;;  %v1011_v48 = vpop.xlane.xlu1 %1010 }
 0x255   :  { %v1271_v15 = vsub.f32 %v2770_v0, %v1191_v52  ;;  %1908 = vlog2.f32 %v1011_v48 }
 0x256   :  { %v1899_v10 = vpop.eup %1898  ;;  %v1272_v57 = vsub.f32 %v2778_v24, %v1193_v7 }
 0x257   :  { %v1901_v6 = vpop.eup %1900  ;;  %1334 = vst [vmem:[#allocation2 + $0x168] sm:$0xff] %v1271_v15  ;;  %v1131_v19 = vmul.f32 0.6931472, %v1899_v10  ;;  %v1073_v46 = vpop.xlane.xlu0 %1072 }
 0x258   :  { %1335 = vst [vmem:[#allocation2 + $0x170] sm:$0xff] %v1272_v57  ;;  %v1133_v29 = vmul.f32 0.6931472, %v1901_v6  ;;  %1910 = vlog2.f32 %v1073_v46  ;;  %v1075_v9 = vpop.xlane.xlu1 %1074 }
 0x259   :  { %v1241_v62 = vsub.f32 %v2781_v38, %v1131_v19  ;;  %1912 = vlog2.f32 %v1075_v9 }
 0x25a   :  { %v1903_v16 = vpop.eup %1902  ;;  %v1242_v21 = vsub.f32 %v2789_v47, %v1133_v29 }
 0x25b   :  { %v1905_v22 = vpop.eup %1904  ;;  %1304 = vst [vmem:[#allocation2 + $0x78] sm:$0xff] %v1241_v62  ;;  %v1195_v0 = vmul.f32 0.6931472, %v1903_v16  ;;  %v1013_v55 = vpop.xlane.xlu0 %1012 }
 0x25c   :  { %1305 = vst [vmem:[#allocation2 + $0x80] sm:$0xff] %v1242_v21  ;;  %v1197_v24 = vmul.f32 0.6931472, %v1905_v22  ;;  %1914 = vlog2.f32 %v1013_v55  ;;  %v1015_v37 = vpop.xlane.xlu1 %1014 }
 0x25d   :  { %v1273_v61 = vsub.f32 %v2786_v14, %v1195_v0  ;;  %1916 = vlog2.f32 %v1015_v37 }
 0x25e   :  { %v1907_v34 = vpop.eup %1906  ;;  %v1274_v27 = vsub.f32 %v2794_v42, %v1197_v24 }
 0x25f   :  { %v1909_v44 = vpop.eup %1908  ;;  %1336 = vst [vmem:[#allocation2 + $0x178] sm:$0xff] %v1273_v61  ;;  %v1135_v38 = vmul.f32 0.6931472, %v1907_v34  ;;  %v1077_v59 = vpop.xlane.xlu0 %1076 }
 0x260   :  { %1337 = vst [vmem:[#allocation2 + $0x180] sm:$0xff] %v1274_v27  ;;  %v1137_v47 = vmul.f32 0.6931472, %v1909_v44  ;;  %1918 = vlog2.f32 %v1077_v59  ;;  %v1079_v20 = vpop.xlane.xlu1 %1078  ;;  %v3053_v27 = vld [vmem:[#allocation19_spill] sm:$0xff] }
 0x261   :  { %v1243_v40 = vsub.f32 %v2797_v56, %v1135_v38  ;;  %1920 = vlog2.f32 %v1079_v20  ;;  %v3054_v20 = vld [vmem:[#allocation18_spill] sm:$0xff] }
 0x262   :  { %v1911_v17 = vpop.eup %1910  ;;  %v1244_v58 = vsub.f32 %v2805_v1, %v1137_v47 }
 0x263   :  { %v1913_v54 = vpop.eup %1912  ;;  %1306 = vst [vmem:[#allocation2 + $0x88] sm:$0xff] %v1243_v40  ;;  %v1199_v14 = vmul.f32 0.6931472, %v1911_v17  ;;  %v1017_v31 = vpop.xlane.xlu0 %1016 }
 0x264   :  { %1307 = vst [vmem:[#allocation2 + $0x90] sm:$0xff] %v1244_v58  ;;  %v1201_v42 = vmul.f32 0.6931472, %v1913_v54  ;;  %1922 = vlog2.f32 %v1017_v31  ;;  %v1019_v35 = vpop.xlane.xlu1 %1018  ;;  %v3055_v58 = vld [vmem:[#allocation20_spill] sm:$0xff] }
 0x265   :  { %v1275_v25 = vsub.f32 %v2802_v33, %v1199_v14  ;;  %1924 = vlog2.f32 %v1019_v35 }
 0x266   :  { %v1915_v36 = vpop.eup %1914  ;;  %v1276_v3 = vsub.f32 %v2810_v60, %v1201_v42 }
 0x267   :  { %v1917_v63 = vpop.eup %1916  ;;  %1338 = vst [vmem:[#allocation2 + $0x188] sm:$0xff] %v1275_v25  ;;  %v1139_v56 = vmul.f32 0.6931472, %v1915_v36  ;;  %v1081_v12 = vpop.xlane.xlu0 %1080  ;;  %v3056_v25 = vld [vmem:[#allocation5_spill] sm:$0xff] }
 0x268   :  { %1339 = vst [vmem:[#allocation2 + $0x190] sm:$0xff] %v1276_v3  ;;  %v1141_v1 = vmul.f32 0.6931472, %v1917_v63  ;;  %1926 = vlog2.f32 %v1081_v12  ;;  %v1083_v28 = vpop.xlane.xlu1 %1082  ;;  %v3057_v63 = vld [vmem:[#allocation6_spill] sm:$0xff] }
 0x269   :  { %v1245_v43 = vsub.f32 %v2813_v13, %v1139_v56  ;;  %1928 = vlog2.f32 %v1083_v28 }
 0x26a   :  { %v1919_v11 = vpop.eup %1918  ;;  %v1246_v49 = vsub.f32 %v2821_v26, %v1141_v1 }
 0x26b   :  { %v1921_v23 = vpop.eup %1920  ;;  %1308 = vst [vmem:[#allocation2 + $0x98] sm:$0xff] %v1245_v43  ;;  %v1203_v33 = vmul.f32 0.6931472, %v1919_v11  ;;  %v1021_v52 = vpop.xlane.xlu0 %1020 }
 0x26c   :  { %1309 = vst [vmem:[#allocation2 + $0xa0] sm:$0xff] %v1246_v49  ;;  %v1205_v60 = vmul.f32 0.6931472, %v1921_v23  ;;  %1930 = vlog2.f32 %v1021_v52  ;;  %v1023_v41 = vpop.xlane.xlu1 %1022 }
 0x26d   :  { %v1277_v7 = vsub.f32 %v2818_v51, %v1203_v33  ;;  %1932 = vlog2.f32 %v1023_v41  ;;  %v3058_v33 = vld [vmem:[#allocation7_spill] sm:$0xff] }
 0x26e   :  { %v1923_v48 = vpop.eup %1922  ;;  %v1278_v15 = vsub.f32 %v2826_v18, %v1205_v60 }
 0x26f   :  { %v1925_v10 = vpop.eup %1924  ;;  %1340 = vst [vmem:[#allocation2 + $0x198] sm:$0xff] %v1277_v7  ;;  %v1143_v13 = vmul.f32 0.6931472, %v1923_v48  ;;  %v1085_v57 = vpop.xlane.xlu0 %1084 }
 0x270   :  { %1341 = vst [vmem:[#allocation2 + $0x1a0] sm:$0xff] %v1278_v15  ;;  %v1145_v26 = vmul.f32 0.6931472, %v1925_v10  ;;  %1934 = vlog2.f32 %v1085_v57  ;;  %v1087_v6 = vpop.xlane.xlu1 %1086 }
 0x271   :  { %v1247_v19 = vsub.f32 %v2829_v39, %v1143_v13  ;;  %1936 = vlog2.f32 %v1087_v6 }
 0x272   :  { %v1927_v46 = vpop.eup %1926  ;;  %v1248_v29 = vsub.f32 %v2837_v53, %v1145_v26 }
 0x273   :  { %v1929_v9 = vpop.eup %1928  ;;  %1310 = vst [vmem:[#allocation2 + $0xa8] sm:$0xff] %v1247_v19  ;;  %v1207_v51 = vmul.f32 0.6931472, %v1927_v46  ;;  %v1025_v62 = vpop.xlane.xlu0 %1024  ;;  %v3059_v46 = vld [vmem:[#allocation8_spill] sm:$0xff] }
 0x274   :  { %1311 = vst [vmem:[#allocation2 + $0xb0] sm:$0xff] %v1248_v29  ;;  %v1209_v18 = vmul.f32 0.6931472, %v1929_v9  ;;  %1938 = vlog2.f32 %v1025_v62  ;;  %v1027_v16 = vpop.xlane.xlu1 %1026 }
 0x275   :  { %v1279_v21 = vsub.f32 %v2834_v5, %v1207_v51  ;;  %1940 = vlog2.f32 %v1027_v16  ;;  %v3060_v51 = vld [vmem:[#allocation9_spill] sm:$0xff] }
 0x276   :  { %v1931_v22 = vpop.eup %1930  ;;  %v1280_v0 = vsub.f32 %v2842_v45, %v1209_v18 }
 0x277   :  { %v1933_v55 = vpop.eup %1932  ;;  %1342 = vst [vmem:[#allocation2 + $0x1a8] sm:$0xff] %v1279_v21  ;;  %v1147_v39 = vmul.f32 0.6931472, %v1931_v22  ;;  %v1089_v24 = vpop.xlane.xlu0 %1088  ;;  %v3061_v21 = vld [vmem:[#allocation10_spill] sm:$0xff] }
 0x278   :  { %1343 = vst [vmem:[#allocation2 + $0x1b0] sm:$0xff] %v1280_v0  ;;  %v1149_v53 = vmul.f32 0.6931472, %v1933_v55  ;;  %1942 = vlog2.f32 %v1089_v24  ;;  %v1091_v37 = vpop.xlane.xlu1 %1090 }
 0x279   :  { %v1249_v61 = vsub.f32 %v2845_v2, %v1147_v39  ;;  %1944 = vlog2.f32 %v1091_v37 }
 0x27a   :  { %v1935_v34 = vpop.eup %1934  ;;  %v1250_v44 = vsub.f32 %v3053_v27, %v1149_v53 }
 0x27b   :  { %v1937_v38 = vpop.eup %1936  ;;  %1312 = vst [vmem:[#allocation2 + $0xb8] sm:$0xff] %v1249_v61  ;;  %v1211_v5 = vmul.f32 0.6931472, %v1935_v34  ;;  %v1029_v59 = vpop.xlane.xlu0 %1028  ;;  %v3062_v61 = vld [vmem:[#allocation12_spill] sm:$0xff] }
 0x27c   :  { %1313 = vst [vmem:[#allocation2 + $0xc0] sm:$0xff] %v1250_v44  ;;  %v1213_v45 = vmul.f32 0.6931472, %v1937_v38  ;;  %1946 = vlog2.f32 %v1029_v59  ;;  %v1031_v47 = vpop.xlane.xlu1 %1030  ;;  %v3063_v44 = vld [vmem:[#allocation13_spill] sm:$0xff] }
 0x27d   :  { %v1281_v40 = vsub.f32 %v3054_v20, %v1211_v5  ;;  %1948 = vlog2.f32 %v1031_v47 }
 0x27e   :  { %v1939_v17 = vpop.eup %1938  ;;  %v1282_v54 = vsub.f32 %v3055_v58, %v1213_v45 }
 0x27f   :  { %v1941_v14 = vpop.eup %1940  ;;  %1344 = vst [vmem:[#allocation2 + $0x1b8] sm:$0xff] %v1281_v40  ;;  %v1151_v2 = vmul.f32 0.6931472, %v1939_v17  ;;  %v1093_v31 = vpop.xlane.xlu0 %1092 }
 0x280   :  { %1345 = vst [vmem:[#allocation2 + $0x1c0] sm:$0xff] %v1282_v54  ;;  %v1153_v42 = vmul.f32 0.6931472, %v1941_v14  ;;  %1950 = vlog2.f32 %v1093_v31  ;;  %v1095_v35 = vpop.xlane.xlu1 %1094 }
 0x281   :  { %v1251_v36 = vsub.f32 %v3056_v25, %v1151_v2  ;;  %1952 = vlog2.f32 %v1095_v35 }
 0x282   :  { %v1943_v3 = vpop.eup %1942  ;;  %v1252_v56 = vsub.f32 %v3057_v63, %v1153_v42 }
 0x283   :  { %v1945_v12 = vpop.eup %1944  ;;  %1314 = vst [vmem:[#allocation2 + $0xc8] sm:$0xff] %v1251_v36  ;;  %v1215_v1 = vmul.f32 0.6931472, %v1943_v3  ;;  %v1033_v28 = vpop.xlane.xlu0 %1032 }
 0x284   :  { %1315 = vst [vmem:[#allocation2 + $0xd0] sm:$0xff] %v1252_v56  ;;  %v1217_v43 = vmul.f32 0.6931472, %v1945_v12  ;;  %1954 = vlog2.f32 %v1033_v28  ;;  %v1035_v11 = vpop.xlane.xlu1 %1034 }
 0x285   :  { %v1283_v49 = vsub.f32 %v2866_v32, %v1215_v1  ;;  %1956 = vlog2.f32 %v1035_v11 }
 0x286   :  { %v1947_v23 = vpop.eup %1946  ;;  %v1284_v52 = vsub.f32 %v3058_v33, %v1217_v43 }
 0x287   :  { %v1949_v60 = vpop.eup %1948  ;;  %1346 = vst [vmem:[#allocation2 + $0x1c8] sm:$0xff] %v1283_v49  ;;  %v1155_v41 = vmul.f32 0.6931472, %v1947_v23 }
 0x288   :  { %1347 = vst [vmem:[#allocation2 + $0x1d0] sm:$0xff] %v1284_v52  ;;  %v1157_v7 = vmul.f32 0.6931472, %v1949_v60  ;;  %v1099_v15 = vpop.xlane.xlu1 %1098 }
 0x289   :  { %v1037_v48 = vpop.xlane.xlu0 %1036  ;;  %v1253_v10 = vsub.f32 %v2877_v8, %v1155_v41 }
 0x28a   :  { %1958 = vlog2.f32 %v1037_v48  ;;  %v1951_v13 = vpop.eup %1950  ;;  %v1254_v57 = vsub.f32 %v2885_v50, %v1157_v7 }
 0x28b   :  { %1960 = vlog2.f32 %v1099_v15  ;;  %v1953_v26 = vpop.eup %1952  ;;  %1316 = vst [vmem:[#allocation2 + $0xd8] sm:$0xff] %v1253_v10  ;;  %v1219_v32 = vmul.f32 0.6931472, %v1951_v13 }
 0x28c   :  { %1317 = vst [vmem:[#allocation2 + $0xe0] sm:$0xff] %v1254_v57  ;;  %v1221_v6 = vmul.f32 0.6931472, %v1953_v26 }
 0x28d   :  { %v1097_v19 = vpop.xlane.xlu0 %1096  ;;  %v1285_v29 = vsub.f32 %v3059_v46, %v1219_v32 }
 0x28e   :  { %1962 = vlog2.f32 %v1097_v19  ;;  %v1955_v9 = vpop.eup %1954  ;;  %v1286_v62 = vsub.f32 %v3060_v51, %v1221_v6 }
 0x28f   :  { %v1957_v18 = vpop.eup %1956  ;;  %1348 = vst [vmem:[#allocation2 + $0x1d8] sm:$0xff] %v1285_v29  ;;  %v1159_v8 = vmul.f32 0.6931472, %v1955_v9 }
 0x290   :  { %1349 = vst [vmem:[#allocation2 + $0x1e0] sm:$0xff] %v1286_v62  ;;  %v1161_v16 = vmul.f32 0.6931472, %v1957_v18 }
 0x291   :  { %v1255_v50 = vsub.f32 %v3061_v21, %v1159_v8 }
 0x292   :  { %v1256_v22 = vsub.f32 %v2898_v30, %v1161_v16 }
 0x293   :  { %1318 = vst [vmem:[#allocation2 + $0xe8] sm:$0xff] %v1255_v50 }
 0x294   :  { %v1959_v0 = vpop.eup %1958  ;;  %1319 = vst [vmem:[#allocation2 + $0xf0] sm:$0xff] %v1256_v22 }
 0x295   :  { %v1961_v55 = vpop.eup %1960  ;;  %v1163_v39 = vmul.f32 0.6931472, %v1959_v0 }
 0x296   :  { %v1225_v24 = vmul.f32 0.6931472, %v1961_v55 }
 0x297   :  { %v1257_v53 = vsub.f32 %v2905_v4, %v1163_v39 }
 0x298   :  { %v1963_v37 = vpop.eup %1962  ;;  %v1288_v34 = vsub.f32 %v3062_v61, %v1225_v24 }
 0x299   :  { %1320 = vst [vmem:[#allocation2 + $0xf8] sm:$0xff] %v1257_v53  ;;  %v1223_v27 = vmul.f32 0.6931472, %v1963_v37 }
 0x29a   :  { %1351 = vst [vmem:[#allocation2 + $0x1f0] sm:$0xff] %v1288_v34 }
 0x29b   :  { %v1287_v38 = vsub.f32 %v3063_v44, %v1223_v27 }
 0x29d   :  { %1350 = vst [vmem:[#allocation2 + $0x1e8] sm:$0xff] %v1287_v38 }
 0x29e   :  { %1975 = shalt.err (!%p1972_p4)
}
 0x29f   :  { %s1976_s11 = scalar_lea.hbm %s2991_s3, 8064 }
 0x2a0   :  { %p1977_p5 = scmp.ne.s32.totalorder %s2991_s3, %s1976_s11  ;;  %p1980_p6 = scmp.lt.u32.totalorder %s1976_s11, %s2991_s3 }
 0x2a2   :  { %p1982_p7 = pnand %p1980_p6, %p1977_p5 }
 0x2a4   :  { %1985 = shalt.err (!%p1982_p7)
}
 0x2a5   :  { %s1992_s16 = smov 128   ;;  %s1993_s17 = smov 8  }
 0x2a6   :  { %1363 = dma.vmem_to_hbm [thread:$0]  %s1358_s2, 8064, %s2991_s3, [#allocation3], %s1992_s16, %s1992_s16, %s1993_s17  }
 0x2a7   :  { %1986 = dma.done.wait [#allocation3], 8064  }
 0x2a8   :  { %1987 = vsyncadd [#allocation3], 4294959232 }
 0x2a9   :  { %1367 = vsyncpa [#allocation3], 1 }

</bundles_post_ra>
